<compile_context>
chip_gen: v5e
topology: v5e:2x2
jax: 0.10.0
libtpu: 0.0.40
codegen_flags: <defaults>
</compile_context>

<pallas_src>
import functools
import math

import jax
import jax.numpy as jnp
import numpy as np
from jax.experimental import pallas as pl
from jax.experimental.pallas import tpu as pltpu


def _round_up(x, m):
    return ((x + m - 1) // m) * m


# --------------------------------------------------------------------------- kernels
def _seg_emb_gather_kernel(widx_ref, pidx_ref, wtab_ref, pe_ref, out_ref, *, tok, d):
    """Preferred path: direct row gathers from VMEM-resident tables.

    widx_ref : (tok, 1)   int32  word row (sqrt(D) already folded into the table)
    pidx_ref : (tok, 1)   int32  PE row   (row 0 is the all-zero "no position" row)
    wtab_ref : (Vpad, D)  f32    resident word table
    pe_ref   : (Ppad, D)  f32    resident sinusoid table
    out_ref  : (tok, D)   f32
    """
    w = jnp.broadcast_to(widx_ref[...], (tok, d))                 # (tok, D) int32
    p = jnp.broadcast_to(pidx_ref[...], (tok, d))
    emb = jnp.take_along_axis(wtab_ref[...], w, axis=0)           # (tok, D)
    pos = jnp.take_along_axis(pe_ref[...], p, axis=0)             # (tok, D)
    out_ref[...] = emb + pos


def _seg_emb_onehot_kernel(widx_ref, pidx_ref, tab_ref, out_ref, *, tok, k, vpad):
    """Fallback path (no in-kernel dynamic-gather support): one fused one-hot MXU
    matmul against the concatenated [word_table*sqrt(D); pe_table] slab.  Each row
    of the one-hot has two ones (word column, PE column) so scale+add happen inside
    a single MXU pass."""
    cols = jax.lax.broadcasted_iota(jnp.int32, (tok, k), 1)
    oh = ((cols == widx_ref[...]) | (cols == (pidx_ref[...] + vpad))
          ).astype(jnp.float32)                                   # (tok, K)
    out_ref[...] = jnp.dot(oh, tab_ref[...], preferred_element_type=jnp.float32)


# --------------------------------------------------------------------------- pallas_call wrappers
def _vmem_limit_bytes(resident_bytes, tok, d, extra_bytes=0):
    # resident tables (x2 pipeline-buffer allowance) + double-buffered output tile
    # + double-buffered (lane-padded) index tiles + headroom; never below the
    # default scoped limit.
    need = (2 * resident_bytes + 2 * tok * d * 4 + 2 * 2 * tok * 128 * 4
            + extra_bytes + (8 << 20))
    return int(min(128 << 20, max(32 << 20, need)))


def _run_gather(widx, pidx, wtab, petab, npad, tok, d):
    vpad, ppad = wtab.shape[0], petab.shape[0]
    kernel = functools.partial(_seg_emb_gather_kernel, tok=tok, d=d)
    return pl.pallas_call(
        kernel,
        out_shape=jax.ShapeDtypeStruct((npad, d), jnp.float32),
        grid=(npad // tok,),
        in_specs=[
            pl.BlockSpec((tok, 1), lambda i: (i, 0)),             # word ids
            pl.BlockSpec((tok, 1), lambda i: (i, 0)),             # PE rows
            pl.BlockSpec((vpad, d), lambda i: (0, 0)),            # resident word table
            pl.BlockSpec((ppad, d), lambda i: (0, 0)),            # resident PE table
        ],
        out_specs=pl.BlockSpec((tok, d), lambda i: (i, 0)),
        compiler_params=pltpu.CompilerParams(
            dimension_semantics=("parallel",),
            vmem_limit_bytes=_vmem_limit_bytes(wtab.nbytes + petab.nbytes, tok, d),
        ),
    )(widx, pidx, wtab, petab)


def _run_onehot(widx, pidx, wtab, petab, npad, tok, d):
    vpad = wtab.shape[0]
    tab = jnp.concatenate([wtab, petab], axis=0)                  # (K, D), K % 256 == 0
    k = tab.shape[0]
    kernel = functools.partial(_seg_emb_onehot_kernel, tok=tok, k=k, vpad=vpad)
    return pl.pallas_call(
        kernel,
        out_shape=jax.ShapeDtypeStruct((npad, d), jnp.float32),
        grid=(npad // tok,),
        in_specs=[
            pl.BlockSpec((tok, 1), lambda i: (i, 0)),
            pl.BlockSpec((tok, 1), lambda i: (i, 0)),
            pl.BlockSpec((k, d), lambda i: (0, 0)),               # fused resident table
        ],
        out_specs=pl.BlockSpec((tok, d), lambda i: (i, 0)),
        compiler_params=pltpu.CompilerParams(
            dimension_semantics=("parallel",),
            vmem_limit_bytes=_vmem_limit_bytes(tab.nbytes, tok, d,
                                               extra_bytes=2 * tok * k * 4),
        ),
    )(widx, pidx, tab)


# --------------------------------------------------------------------------- forward
def segment_embeddings_forward(source, word_table, pe_table, word_padding_idx,
                               tok_tile=256):
    """Pallas implementation of SegmentEmbeddings.forward.

    source     : (B, S, T, nfeat) int  -- only feature 0 is used (nfeat == 1 here)
    word_table : (V, D) f32            -- row `word_padding_idx` is zero (nn.Embedding init)
    pe_table   : (P, D) f32            -- first P rows of the sinusoid table (P >= max pos)
    returns    : (B, S, T, D) f32
    """
    B, S, T, _ = source.shape
    V, D = word_table.shape
    P = pe_table.shape[0]

    idx = source[..., 0].astype(jnp.int32)                        # (B, S, T)

    # --- SegmentPositionEncoding's concatenated-PE index arithmetic (XLA glue) ---
    # position_mask in torch order (S, T, B); the k-th True element in (s, t, b)
    # C-order receives row (k - start_of_its_batch_group) of the sinusoid table.
    mask_stb = jnp.transpose(idx, (1, 2, 0)) != word_padding_idx  # (S, T, B)
    flat = mask_stb.reshape(-1)
    rank = jnp.cumsum(flat.astype(jnp.int32)) - 1                 # rank among True
    seq_len = jnp.sum(mask_stb.astype(jnp.int32), axis=(0, 1))    # (B,)
    cum = jnp.cumsum(seq_len)
    grp = jnp.searchsorted(cum, rank, side="right")
    start = jnp.where(grp == 0, 0, cum[jnp.clip(grp - 1, 0, B - 1)])
    pos = jnp.where(flat, rank - start, -1)                       # -1 => no PE added
    pos_bst = jnp.transpose(pos.reshape(S, T, B), (2, 0, 1)).reshape(-1)
    widx = idx.reshape(-1)
    # TODO(synk): SequenceTooLongError (seq_len.max() > max_len) host-side raise omitted.

    # --- one-time parameter prep: pad rows to 256 (MXU-friendly K for the fallback),
    #     fold sqrt(D) into the word table, reserve PE row 0 as the all-zero
    #     "no position" row and the last word row as the "invalid id" zero row.
    ROW = 256
    vpad = _round_up(V + 1, ROW)
    ppad = _round_up(P + 1, ROW)
    scale = math.sqrt(D)
    wtab = jnp.zeros((vpad, D), jnp.float32).at[:V].set(
        word_table.astype(jnp.float32) * scale)
    petab = jnp.zeros((ppad, D), jnp.float32).at[1:P + 1].set(
        pe_table.astype(jnp.float32))

    # --- index prep: exact "silent zero" semantics for out-of-range ids/positions ---
    widx = jnp.where((widx >= 0) & (widx < V), widx, vpad - 1)    # -> guaranteed zero row
    pidx = jnp.clip(pos_bst + 1, 0, ppad - 1)                     # -1 -> zero row 0

    N = B * S * T
    npad = _round_up(N, tok_tile)
    if npad != N:
        widx = jnp.concatenate([widx, jnp.full((npad - N,), vpad - 1, jnp.int32)])
        pidx = jnp.concatenate([pidx, jnp.zeros((npad - N,), jnp.int32)])
    widx = widx.reshape(npad, 1).astype(jnp.int32)
    pidx = pidx.reshape(npad, 1).astype(jnp.int32)

    # TODO(synk): for vocabularies whose table does not fit VMEM, switch to an
    #             HBM-resident table (memory_space=pl.ANY) with scalar-prefetched ids
    #             driving a DMA row gather instead of the resident-table gather.
    try:
        out = _run_gather(widx, pidx, wtab, petab, npad, tok_tile, D)
        out.block_until_ready()
    except Exception:   # Mosaic build without in-kernel dynamic-gather support
        out = _run_onehot(widx, pidx, wtab, petab, npad, tok_tile, D)

    # dropout has p=0 in this configuration -> identity.
    return out[:N].reshape(B, S, T, D)


# --------------------------------------------------------------------------- params
def make_sinusoid_table(max_len, dim):
    assert dim % 2 == 0
    position = jnp.arange(max_len, dtype=jnp.float32)[:, None]
    div_term = jnp.exp(jnp.arange(0, dim, 2, dtype=jnp.float32)
                       * (-math.log(10000.0) / dim))
    pe = jnp.zeros((max_len, dim), jnp.float32)
    pe = pe.at[:, 0::2].set(jnp.sin(position * div_term))
    pe = pe.at[:, 1::2].set(jnp.cos(position * div_term))
    return pe


# --------------------------------------------------------------------------- reference
def reference_forward(source, word_table, pe_full, pad_idx):
    """Pure numpy transliteration of the PyTorch forward (including the exact
    boolean-mask / concatenated-position-embedding assignment semantics)."""
    source = np.asarray(source)
    W = np.asarray(word_table)
    pe = np.asarray(pe_full)
    B, S, T, _ = source.shape
    D = W.shape[1]
    idx = source[..., 0]
    emb = W[idx].astype(np.float32)                               # (B,S,T,D)
    x = np.transpose(emb, (1, 2, 0, 3)).copy() * math.sqrt(D)     # (S,T,B,D)
    mask = np.transpose(idx, (1, 2, 0)) != pad_idx                # (S,T,B)
    seq_len = mask.sum(axis=(0, 1))
    if mask.sum():
        pos_emb = np.concatenate([pe[:seq_len[b]] for b in range(B)], axis=0)
    else:
        pos_emb = np.zeros((0, D), np.float32)
    x[mask] = x[mask] + pos_emb
    return np.transpose(x, (2, 0, 1, 3))                          # (B,S,T,D)


# --------------------------------------------------------------------------- main
if __name__ == "__main__":
    B, S, T, NFEAT = 2, 3, 8, 1        # batch, segment_count, segment_max_len, nfeat
    V, D, PAD = 64, 128, 1             # word_vocab_size, word_vec_size, word_padding_idx
    MAX_LEN = 5000                     # SegmentPositionEncoding default

    key = jax.random.PRNGKey(0)
    k_ids, k_len, k_tab = jax.random.split(key, 3)

    # deterministic synthetic token ids with explicit padding tails per segment
    ids = jax.random.randint(k_ids, (B, S, T, NFEAT), 0, V, dtype=jnp.int32)
    ids = jnp.where(ids == PAD, (PAD + 7) % V, ids)
    lens = jax.random.randint(k_len, (B, S), 1, T + 1, dtype=jnp.int32)
    tail = jnp.arange(T)[None, None, :] >= lens[:, :, None]
    source = jnp.where(tail[..., None], PAD, ids)                 # (B,S,T,1)

    # deterministic parameters: nn.Embedding ~ N(0,1), padding row zeroed
    word_table = jax.random.normal(k_tab, (V, D), dtype=jnp.float32)
    word_table = word_table.at[PAD].set(0.0)

    pe_full = make_sinusoid_table(MAX_LEN, D)
    pe_slab = pe_full[: S * T]         # only positions < S*T are reachable

    out = segment_embeddings_forward(source, word_table, pe_slab, PAD)
    jax.block_until_ready(out)

    ref = reference_forward(source, word_table, pe_full, PAD)
    np.testing.assert_allclose(np.asarray(out), ref, rtol=1e-5, atol=1e-3)
    print("KERNEL_OK")
</pallas_src>

<mosaic_0001>
module attributes {stable_mosaic.version = 11 : i64} {
  func.func @_seg_emb_gather_kernel(%arg0: i32, %arg1: memref<256x1xi32, #tpu.memory_space<vmem>>, %arg2: memref<256x1xi32, #tpu.memory_space<vmem>>, %arg3: memref<256x128xf32, #tpu.memory_space<vmem>>, %arg4: memref<256x128xf32, #tpu.memory_space<vmem>>, %arg5: memref<256x128xf32, #tpu.memory_space<vmem>>) attributes {dimension_semantics = [#tpu.dimension_semantics<parallel>], iteration_bounds = array<i64: 1>, scalar_prefetch = 0 : i64, scratch_operands = 0 : i64, tpu.core_type = #tpu.core_type<tc>, window_params = [{transform_indices = @transform_0, window_bounds = array<i64: 256, 1>}, {transform_indices = @transform_1, window_bounds = array<i64: 256, 1>}, {pipeline_mode = #tpu.pipeline_mode<synchronous>, transform_indices = @transform_2, window_bounds = array<i64: 256, 128>}, {pipeline_mode = #tpu.pipeline_mode<synchronous>, transform_indices = @transform_3, window_bounds = array<i64: 256, 128>}, {transform_indices = @transform_4, window_bounds = array<i64: 256, 128>}]} {
    %c0 = arith.constant 0 : index
    %c0_0 = arith.constant 0 : index
    %0 = vector.load %arg1[%c0, %c0_0] : memref<256x1xi32, #tpu.memory_space<vmem>>, vector<256x1xi32>
    %1 = vector.shape_cast %0 : vector<256x1xi32> to vector<256x1xi32>
    %2 = vector.broadcast %1 : vector<256x1xi32> to vector<256x128xi32>
    %c0_1 = arith.constant 0 : index
    %c0_2 = arith.constant 0 : index
    %3 = vector.load %arg2[%c0_1, %c0_2] : memref<256x1xi32, #tpu.memory_space<vmem>>, vector<256x1xi32>
    %4 = vector.shape_cast %3 : vector<256x1xi32> to vector<256x1xi32>
    %5 = vector.broadcast %4 : vector<256x1xi32> to vector<256x128xi32>
    %c0_3 = arith.constant 0 : index
    %c0_4 = arith.constant 0 : index
    %6 = vector.load %arg3[%c0_3, %c0_4] : memref<256x128xf32, #tpu.memory_space<vmem>>, vector<256x128xf32>
    %c0_i32 = arith.constant 0 : i32
    %7 = vector.broadcast %c0_i32 : i32 to vector<256x128xi32>
    %8 = arith.cmpi slt, %2, %7 : vector<256x128xi32>
    %c256_i32 = arith.constant 256 : i32
    %9 = vector.broadcast %c256_i32 : i32 to vector<256x128xi32>
    %10 = arith.addi %2, %9 : vector<256x128xi32>
    %11 = arith.select %8, %10, %2 : vector<256x128xi1>, vector<256x128xi32>
    %12 = vector.shape_cast %11 : vector<256x128xi32> to vector<256x128x1xi32>
    %13 = vector.shape_cast %12 : vector<256x128x1xi32> to vector<256x128xi32>
    %14 = tpu.dynamic_gather %6[%13] in [0] : vector<256x128xf32>, vector<256x128xi32> -> vector<256x128xf32>
    %c0_5 = arith.constant 0 : index
    %c0_6 = arith.constant 0 : index
    %15 = vector.load %arg4[%c0_5, %c0_6] : memref<256x128xf32, #tpu.memory_space<vmem>>, vector<256x128xf32>
    %c0_i32_7 = arith.constant 0 : i32
    %16 = vector.broadcast %c0_i32_7 : i32 to vector<256x128xi32>
    %17 = arith.cmpi slt, %5, %16 : vector<256x128xi32>
    %c256_i32_8 = arith.constant 256 : i32
    %18 = vector.broadcast %c256_i32_8 : i32 to vector<256x128xi32>
    %19 = arith.addi %5, %18 : vector<256x128xi32>
    %20 = arith.select %17, %19, %5 : vector<256x128xi1>, vector<256x128xi32>
    %21 = vector.shape_cast %20 : vector<256x128xi32> to vector<256x128x1xi32>
    %22 = vector.shape_cast %21 : vector<256x128x1xi32> to vector<256x128xi32>
    %23 = tpu.dynamic_gather %15[%22] in [0] : vector<256x128xf32>, vector<256x128xi32> -> vector<256x128xf32>
    %24 = arith.addf %14, %23 : vector<256x128xf32>
    %c0_9 = arith.constant 0 : index
    %c0_10 = arith.constant 0 : index
    %25 = vector.load %arg5[%c0_9, %c0_10] : memref<256x128xf32, #tpu.memory_space<vmem>>, vector<256x128xf32>
    tpu.vector_store %arg5[%c0_9, %c0_10], %24 {strides = array<i32>} : memref<256x128xf32, #tpu.memory_space<vmem>>, vector<256x128xf32>,
    return
  }
  func.func @transform_0(%arg0: i32) -> (i32, i32) {
    %c0_i32 = arith.constant 0 : i32
    %c0_i32_0 = arith.constant 0 : i32
    return %arg0, %c0_i32 : i32, i32
  }
  func.func @transform_1(%arg0: i32) -> (i32, i32) {
    %c0_i32 = arith.constant 0 : i32
    %c0_i32_0 = arith.constant 0 : i32
    return %arg0, %c0_i32 : i32, i32
  }
  func.func @transform_2(%arg0: i32) -> (i32, i32) {
    %c0_i32 = arith.constant 0 : i32
    %c0_i32_0 = arith.constant 0 : i32
    %c0_i32_1 = arith.constant 0 : i32
    return %c0_i32, %c0_i32_0 : i32, i32
  }
  func.func @transform_3(%arg0: i32) -> (i32, i32) {
    %c0_i32 = arith.constant 0 : i32
    %c0_i32_0 = arith.constant 0 : i32
    %c0_i32_1 = arith.constant 0 : i32
    return %c0_i32, %c0_i32_0 : i32, i32
  }
  func.func @transform_4(%arg0: i32) -> (i32, i32) {
    %c0_i32 = arith.constant 0 : i32
    %c0_i32_0 = arith.constant 0 : i32
    return %arg0, %c0_i32 : i32, i32
  }
}

module attributes {stable_mosaic.version = 11 : i64} {
  func.func @_seg_emb_onehot_kernel(%arg0: i32, %arg1: memref<256x1xi32, #tpu.memory_space<vmem>>, %arg2: memref<256x1xi32, #tpu.memory_space<vmem>>, %arg3: memref<512x128xf32, #tpu.memory_space<vmem>>, %arg4: memref<256x128xf32, #tpu.memory_space<vmem>>) attributes {dimension_semantics = [#tpu.dimension_semantics<parallel>], iteration_bounds = array<i64: 1>, scalar_prefetch = 0 : i64, scratch_operands = 0 : i64, tpu.core_type = #tpu.core_type<tc>, window_params = [{transform_indices = @transform_0, window_bounds = array<i64: 256, 1>}, {transform_indices = @transform_1, window_bounds = array<i64: 256, 1>}, {pipeline_mode = #tpu.pipeline_mode<synchronous>, transform_indices = @transform_2, window_bounds = array<i64: 512, 128>}, {transform_indices = @transform_3, window_bounds = array<i64: 256, 128>}]} {
    %0 = tpu.iota {dimensions = array<i32: 1>} : vector<256x512xi32>
    %c0 = arith.constant 0 : index
    %c0_0 = arith.constant 0 : index
    %1 = vector.load %arg1[%c0, %c0_0] : memref<256x1xi32, #tpu.memory_space<vmem>>, vector<256x1xi32>
    %2 = vector.broadcast %1 : vector<256x1xi32> to vector<256x512xi32>
    %3 = arith.cmpi eq, %0, %2 : vector<256x512xi32>
    %c0_1 = arith.constant 0 : index
    %c0_2 = arith.constant 0 : index
    %4 = vector.load %arg2[%c0_1, %c0_2] : memref<256x1xi32, #tpu.memory_space<vmem>>, vector<256x1xi32>
    %c256_i32 = arith.constant 256 : i32
    %5 = vector.broadcast %c256_i32 : i32 to vector<256x1xi32>
    %6 = arith.addi %4, %5 : vector<256x1xi32>
    %7 = vector.broadcast %6 : vector<256x1xi32> to vector<256x512xi32>
    %8 = arith.cmpi eq, %0, %7 : vector<256x512xi32>
    %9 = arith.ori %3, %8 : vector<256x512xi1>
    %10 = arith.extui %9 : vector<256x512xi1> to vector<256x512xi32>
    %11 = arith.sitofp %10 : vector<256x512xi32> to vector<256x512xf32>
    %c0_3 = arith.constant 0 : index
    %c0_4 = arith.constant 0 : index
    %12 = vector.load %arg3[%c0_3, %c0_4] : memref<512x128xf32, #tpu.memory_space<vmem>>, vector<512x128xf32>
    %cst = arith.constant dense<0.000000e+00> : vector<256x128xf32>
    %13 = tpu.matmul %11, %12, %cst {dimension_numbers = #tpu.dot_dimension_numbers<[1], [0], [0], [1], [0, 0, 1, 1], [], []>} : vector<256x512xf32>, vector<512x128xf32>, vector<256x128xf32> -> vector<256x128xf32>
    %c0_5 = arith.constant 0 : index
    %c0_6 = arith.constant 0 : index
    %14 = vector.load %arg4[%c0_5, %c0_6] : memref<256x128xf32, #tpu.memory_space<vmem>>, vector<256x128xf32>
    tpu.vector_store %arg4[%c0_5, %c0_6], %13 {strides = array<i32>} : memref<256x128xf32, #tpu.memory_space<vmem>>, vector<256x128xf32>,
    return
  }
  func.func @transform_0(%arg0: i32) -> (i32, i32) {
    %c0_i32 = arith.constant 0 : i32
    %c0_i32_0 = arith.constant 0 : i32
    return %arg0, %c0_i32 : i32, i32
  }
  func.func @transform_1(%arg0: i32) -> (i32, i32) {
    %c0_i32 = arith.constant 0 : i32
    %c0_i32_0 = arith.constant 0 : i32
    return %arg0, %c0_i32 : i32, i32
  }
  func.func @transform_2(%arg0: i32) -> (i32, i32) {
    %c0_i32 = arith.constant 0 : i32
    %c0_i32_0 = arith.constant 0 : i32
    %c0_i32_1 = arith.constant 0 : i32
    return %c0_i32, %c0_i32_0 : i32, i32
  }
  func.func @transform_3(%arg0: i32) -> (i32, i32) {
    %c0_i32 = arith.constant 0 : i32
    %c0_i32_0 = arith.constant 0 : i32
    return %arg0, %c0_i32 : i32, i32
  }
}

</mosaic_0001>

<bundles_post_ra>
// kernel: tpu_custom_call.1
= control target key start
LH: loop header
LB: loop body
LE: loop exit
PB: predicated region body
PF: predicated region fallthrough
CT: control target
= control target key end

     0   :  { %v1804_v3 = vmov 0   ;;  %s2611_s0 = inlined_call_operand.vmem [shape: s32[256,1], index: 0, kind: input, shape index: {}]   ;;  %s2612_s1 = inlined_call_operand.vmem [shape: s32[256,1], index: 1, kind: input, shape index: {}]   ;;  %s2613_s2 = inlined_call_operand.vmem [shape: f32[512,128], index: 2, kind: input, shape index: {}]   ;;  %s2614_s3 = inlined_call_operand.hbm [shape: f32[256,128], index: 3, kind: output, shape index: {}]  }
   0x1   :  { %v22_v0 = vld [vmem:[%s2611_s0 + $0x10] sm:$0xff]  ;;  %v21_v1 = vld [vmem:[%s2611_s0 + $0x8] sm:$0xff]  ;;  %v20_v2 = vld [vmem:[%s2611_s0] sm:$0xff]  ;;  %1777 = vset.pattern.permute.xlu2 %v1804_v3  ;;  %1776 = vset.pattern.permute.xlu1 %v1804_v3 }
   0x2   :  { %1775 = vset.pattern.permute.xlu0 %v1804_v3  ;;  %59 = vperm.xlu2 %1777, %v22_v0   ;;  %v278_v4 = vld [vmem:[%s2612_s1 + $0x10] sm:$0xff]  ;;  %v277_v5 = vld [vmem:[%s2612_s1 + $0x8] sm:$0xff]  ;;  %v276_v6 = vld [vmem:[%s2612_s1] sm:$0xff] }
   0x3   :  { %56 = vperm.xlu1 %1776, %v21_v1   ;;  %53 = vperm.xlu0 %1775, %v20_v2  }
   0x4   :  { %8 = vsyncpa [#allocation3], 0  ;;  %v310_v7 = vadd.s32 256, %v278_v4  ;;  %v309_v8 = vadd.s32 256, %v277_v5  ;;  %v308_v9 = vadd.s32 256, %v276_v6  ;;  %v279_v10 = vld [vmem:[%s2612_s1 + $0x18] sm:$0xff] }
   0x5   :  { %v24_v11 = vld [vmem:[%s2611_s0 + $0x20] sm:$0xff]  ;;  %v311_v12 = vadd.s32 256, %v279_v10  ;;  %v23_v13 = vld [vmem:[%s2611_s0 + $0x18] sm:$0xff]  ;;  %v281_v14 = vld [vmem:[%s2612_s1 + $0x28] sm:$0xff]  ;;  %s1502_s25 = sshll.u32 %s2614_s3, 4  ;;  %s1807_s26 = smov 128   ;;  %s1503_s25 = int_to_ptr.hbm [resolvable:$true] %s1502_s25 }
   0x6   :  { %v280_v15 = vld [vmem:[%s2612_s1 + $0x20] sm:$0xff]  ;;  %v313_v16 = vadd.s32 256, %v281_v14  ;;  %v25_v18 = vld [vmem:[%s2611_s0 + $0x28] sm:$0xff]  ;;  %v282_v19 = vld [vmem:[%s2612_s1 + $0x30] sm:$0xff]  ;;  %s1808_s27 = smov 8  }
   0x7   :  { %v312_v17 = vadd.s32 256, %v280_v15  ;;  %v27_v20 = vld [vmem:[%s2611_s0 + $0x38] sm:$0xff]  ;;  %v314_v21 = vadd.s32 256, %v282_v19  ;;  %v26_v22 = vld [vmem:[%s2611_s0 + $0x30] sm:$0xff]  ;;  %v284_v23 = vld [vmem:[%s2612_s1 + $0x40] sm:$0xff] }
   0x8   :  { %v283_v24 = vld [vmem:[%s2612_s1 + $0x38] sm:$0xff]  ;;  %v316_v25 = vadd.s32 256, %v284_v23  ;;  %v28_v27 = vld [vmem:[%s2611_s0 + $0x40] sm:$0xff]  ;;  %v285_v28 = vld [vmem:[%s2612_s1 + $0x48] sm:$0xff] }
   0x9   :  { %v315_v26 = vadd.s32 256, %v283_v24  ;;  %v30_v29 = vld [vmem:[%s2611_s0 + $0x50] sm:$0xff]  ;;  %v317_v30 = vadd.s32 256, %v285_v28  ;;  %v29_v31 = vld [vmem:[%s2611_s0 + $0x48] sm:$0xff]  ;;  %v287_v32 = vld [vmem:[%s2612_s1 + $0x58] sm:$0xff] }
   0xa   :  { %347 = vperm.xlu2 %1777, %v310_v7   ;;  %v286_v33 = vld [vmem:[%s2612_s1 + $0x50] sm:$0xff]  ;;  %v319_v34 = vadd.s32 256, %v287_v32  ;;  %v31_v36 = vld [vmem:[%s2611_s0 + $0x58] sm:$0xff]  ;;  %v288_v37 = vld [vmem:[%s2612_s1 + $0x60] sm:$0xff] }
   0xb   :  { %344 = vperm.xlu1 %1776, %v309_v8   ;;  %341 = vperm.xlu0 %1775, %v308_v9   ;;  %v318_v35 = vadd.s32 256, %v286_v33  ;;  %v963_v38 = vld [vmem:[%s2613_s2 + $0x78] sm:$0xff]  ;;  %v962_v42 = vld [vmem:[%s2613_s2 + $0x70] sm:$0xff]  ;;  %v33_v46 = vld [vmem:[%s2611_s0 + $0x68] sm:$0xff]  ;;  %v320_v47 = vadd.s32 256, %v288_v37 }
   0xc   :  { %v979_v39 = vld [vmem:[%s2613_s2 + $0xf8] sm:$0xff]  ;;  %1012 = vmatpush.msra.mxu0 %v963_v38  ;;  %v978_v43 = vld [vmem:[%s2613_s2 + $0xf0] sm:$0xff]  ;;  %v32_v48 = vld [vmem:[%s2611_s0 + $0x60] sm:$0xff] }
   0xd   :  { %v995_v40 = vld [vmem:[%s2613_s2 + $0x178] sm:$0xff]  ;;  %1125 = vmatpush.msra.mxu1 %v979_v39  ;;  %v994_v44 = vld [vmem:[%s2613_s2 + $0x170] sm:$0xff]  ;;  %v289_v50 = vld [vmem:[%s2612_s1 + $0x68] sm:$0xff] }
   0xe   :  { %v1011_v41 = vld [vmem:[%s2613_s2 + $0x1f8] sm:$0xff]  ;;  %1238 = vmatpush.msra.mxu2 %v995_v40  ;;  %v1010_v45 = vld [vmem:[%s2613_s2 + $0x1f0] sm:$0xff]  ;;  %1013 = vmatpush.msra.mxu0 %v962_v42  ;;  %v961_v51 = vld [vmem:[%s2613_s2 + $0x68] sm:$0xff]  ;;  %v321_v0 = vadd.s32 256, %v289_v50 }
   0xf   :  { %1351 = vmatpush.msra.mxu3 %v1011_v41  ;;  %1126 = vmatpush.msra.mxu1 %v978_v43  ;;  %v290_v49 = vld [vmem:[%s2612_s1 + $0x70] sm:$0xff]  ;;  %v977_v52 = vld [vmem:[%s2613_s2 + $0xe8] sm:$0xff]  ;;  %v960_v55 = vld [vmem:[%s2613_s2 + $0x60] sm:$0xff] }
  0x10   :  { %1239 = vmatpush.msra.mxu2 %v994_v44  ;;  %v993_v53 = vld [vmem:[%s2613_s2 + $0x168] sm:$0xff]  ;;  %1014 = vmatpush.msra.mxu0 %v961_v51  ;;  %v976_v56 = vld [vmem:[%s2613_s2 + $0xe0] sm:$0xff]  ;;  %v959_v59 = vld [vmem:[%s2613_s2 + $0x58] sm:$0xff]  ;;  %v322_v60 = vadd.s32 256, %v290_v49 }
  0x11   :  { %1352 = vmatpush.msra.mxu3 %v1010_v45  ;;  %1127 = vmatpush.msra.mxu1 %v977_v52  ;;  %v1009_v54 = vld [vmem:[%s2613_s2 + $0x1e8] sm:$0xff]  ;;  %v992_v57 = vld [vmem:[%s2613_s2 + $0x160] sm:$0xff]  ;;  %v975_v61 = vld [vmem:[%s2613_s2 + $0xd8] sm:$0xff] }
  0x12   :  { %65 = vperm.xlu2 %1777, %v24_v11   ;;  %1240 = vmatpush.msra.mxu2 %v993_v53  ;;  %v1008_v58 = vld [vmem:[%s2613_s2 + $0x1e0] sm:$0xff]  ;;  %v991_v62 = vld [vmem:[%s2613_s2 + $0x158] sm:$0xff]  ;;  %v958_v1 = vld [vmem:[%s2613_s2 + $0x50] sm:$0xff] }
  0x13   :  { %350 = vperm.xlu1 %1776, %v311_v12   ;;  %62 = vperm.xlu0 %1775, %v23_v13   ;;  %v1007_v63 = vld [vmem:[%s2613_s2 + $0x1d8] sm:$0xff]  ;;  %v34_v2 = vld [vmem:[%s2611_s0 + $0x70] sm:$0xff]  ;;  %v957_v6 = vld [vmem:[%s2613_s2 + $0x48] sm:$0xff] }
  0x14   :  { %1353 = vmatpush.msra.mxu3 %v1009_v54  ;;  %1015 = vmatpush.msra.mxu0 %v960_v55  ;;  %v974_v3 = vld [vmem:[%s2613_s2 + $0xd0] sm:$0xff]  ;;  %v973_v7 = vld [vmem:[%s2613_s2 + $0xc8] sm:$0xff]  ;;  %v291_v9 = vld [vmem:[%s2612_s1 + $0x78] sm:$0xff] }
  0x15   :  { %1128 = vmatpush.msra.mxu1 %v976_v56  ;;  %1241 = vmatpush.msra.mxu2 %v992_v57  ;;  %v990_v4 = vld [vmem:[%s2613_s2 + $0x150] sm:$0xff]  ;;  %v989_v8 = vld [vmem:[%s2613_s2 + $0x148] sm:$0xff]  ;;  %v956_v11 = vld [vmem:[%s2613_s2 + $0x40] sm:$0xff] }
  0x16   :  { %1354 = vmatpush.msra.mxu3 %v1008_v58  ;;  %1016 = vmatpush.msra.mxu0 %v959_v59  ;;  %v1006_v5 = vld [vmem:[%s2613_s2 + $0x1d0] sm:$0xff]  ;;  %v1005_v10 = vld [vmem:[%s2613_s2 + $0x1c8] sm:$0xff]  ;;  %v972_v12 = vld [vmem:[%s2613_s2 + $0xc0] sm:$0xff] }
  0x17   :  { %1129 = vmatpush.msra.mxu1 %v975_v61  ;;  %1242 = vmatpush.msra.mxu2 %v991_v62  ;;  %v988_v13 = vld [vmem:[%s2613_s2 + $0x140] sm:$0xff]  ;;  %v955_v15 = vld [vmem:[%s2613_s2 + $0x38] sm:$0xff]  ;;  %v970_v23 = vld [vmem:[%s2613_s2 + $0xb0] sm:$0xff] }
  0x18   :  { %1355 = vmatpush.msra.mxu3 %v1007_v63  ;;  %1017 = vmatpush.msra.mxu0 %v958_v1  ;;  %v1004_v14 = vld [vmem:[%s2613_s2 + $0x1c0] sm:$0xff]  ;;  %v35_v19 = vld [vmem:[%s2611_s0 + $0x78] sm:$0xff]  ;;  %v293_v24 = vld [vmem:[%s2612_s1 + $0x88] sm:$0xff] }
  0x19   :  { %1130 = vmatpush.msra.mxu1 %v974_v3  ;;  %1243 = vmatpush.msra.mxu2 %v990_v4  ;;  %v953_v28 = vld [vmem:[%s2613_s2 + $0x28] sm:$0xff]  ;;  %v325_v32 = vadd.s32 256, %v293_v24  ;;  %v952_v33 = vld [vmem:[%s2613_s2 + $0x20] sm:$0xff]  ;;  %v951_v39 = vld [vmem:[%s2613_s2 + $0x18] sm:$0xff] }
  0x1a   :  { %356 = vperm.xlu2 %1777, %v313_v16   ;;  %1356 = vmatpush.msra.mxu3 %v1006_v5  ;;  %v36_v16 = vld [vmem:[%s2611_s0 + $0x80] sm:$0xff]  ;;  %v37_v37 = vld [vmem:[%s2611_s0 + $0x88] sm:$0xff]  ;;  %v967_v40 = vld [vmem:[%s2613_s2 + $0x98] sm:$0xff]  ;;  %v15_v5 = vlaneseq }
  0x1b   :  { %68 = vperm.xlu1 %1776, %v25_v18   ;;  %353 = vperm.xlu0 %1775, %v312_v17   ;;  %v323_v17 = vadd.s32 256, %v291_v9  ;;  %v971_v18 = vld [vmem:[%s2613_s2 + $0xb8] sm:$0xff]  ;;  %v1000_v38 = vld [vmem:[%s2613_s2 + $0x1a0] sm:$0xff]  ;;  %v950_v43 = vld [vmem:[%s2613_s2 + $0x10] sm:$0xff] }
  0x1c   :  { %1018 = vmatpush.msra.mxu0 %v957_v6  ;;  %1131 = vmatpush.msra.mxu1 %v973_v7  ;;  %v983_v41 = vld [vmem:[%s2613_s2 + $0x118] sm:$0xff]  ;;  %v294_v44 = vld [vmem:[%s2612_s1 + $0x90] sm:$0xff]  ;;  %v965_v49 = vld [vmem:[%s2613_s2 + $0x88] sm:$0xff] }
  0x1d   :  { %1244 = vmatpush.msra.mxu2 %v989_v8  ;;  %1357 = vmatpush.msra.mxu3 %v1005_v10  ;;  %v999_v42 = vld [vmem:[%s2613_s2 + $0x198] sm:$0xff]  ;;  %v966_v45 = vld [vmem:[%s2613_s2 + $0x90] sm:$0xff]  ;;  %v981_v50 = vld [vmem:[%s2613_s2 + $0x108] sm:$0xff]  ;;  %v326_v52 = vadd.s32 256, %v294_v44 }
  0x1e   :  { %1019 = vmatpush.msra.mxu0 %v956_v11  ;;  %1132 = vmatpush.msra.mxu1 %v972_v12  ;;  %v39_v51 = vld [vmem:[%s2611_s0 + $0x98] sm:$0xff]  ;;  %v997_v53 = vld [vmem:[%s2613_s2 + $0x188] sm:$0xff]  ;;  %v38_v54 = vld [vmem:[%s2611_s0 + $0x90] sm:$0xff]  ;;  %v2162_v11 = vand.u32 127, %v15_v5 }
  0x1f   :  { %1245 = vmatpush.msra.mxu2 %v988_v13  ;;  %1358 = vmatpush.msra.mxu3 %v1004_v14  ;;  %v948_v55 = vld [vmem:[%s2613_s2] sm:$0xff]  ;;  %v42_v1 = vld [vmem:[%s2611_s0 + $0xb0] sm:$0xff]  ;;  %v41_v3 = vld [vmem:[%s2611_s0 + $0xa8] sm:$0xff] }
  0x20   :  { %1020 = vmatpush.msra.mxu0 %v955_v15  ;;  %1133 = vmatpush.msra.mxu1 %v971_v18  ;;  %v964_v56 = vld [vmem:[%s2613_s2 + $0x80] sm:$0xff]  ;;  %v299_v4 = vld [vmem:[%s2612_s1 + $0xb8] sm:$0xff]  ;;  %v298_v6 = vld [vmem:[%s2612_s1 + $0xb0] sm:$0xff]  ;;  %v2168_v13 = vadd.s32 128, %v2162_v11  ;;  %v2171_v14 = vadd.s32 256, %v2162_v11 }
  0x21   :  { %v980_v57 = vld [vmem:[%s2613_s2 + $0x100] sm:$0xff]  ;;  %v331_v8 = vadd.s32 256, %v299_v4  ;;  %v330_v10 = vadd.s32 256, %v298_v6  ;;  %v43_v12 = vld [vmem:[%s2611_s0 + $0xb8] sm:$0xff]  ;;  %v45_v18 = vld [vmem:[%s2611_s0 + $0xc8] sm:$0xff] }
  0x22   :  { %74 = vperm.xlu2 %1777, %v27_v20   ;;  %v987_v20 = vld [vmem:[%s2613_s2 + $0x138] sm:$0xff]  ;;  %1134 = vmatpush.msra.mxu1 %v970_v23  ;;  %v996_v58 = vld [vmem:[%s2613_s2 + $0x180] sm:$0xff]  ;;  %v302_v24 = vld [vmem:[%s2612_s1 + $0xd0] sm:$0xff] }
  0x23   :  { %359 = vperm.xlu1 %1776, %v314_v21   ;;  %71 = vperm.xlu0 %1775, %v26_v22   ;;  %v1003_v21 = vld [vmem:[%s2613_s2 + $0x1b8] sm:$0xff]  ;;  %v954_v22 = vld [vmem:[%s2613_s2 + $0x30] sm:$0xff]  ;;  %v296_v59 = vld [vmem:[%s2612_s1 + $0xa0] sm:$0xff] }
  0x24   :  { %1246 = vmatpush.msra.mxu2 %v987_v20  ;;  %1359 = vmatpush.msra.mxu3 %v1003_v21  ;;  %v328_v61 = vadd.s32 256, %v296_v59  ;;  %v40_v63 = vld [vmem:[%s2611_s0 + $0xa0] sm:$0xff]  ;;  %v1805_v20 = vmov 1.0  }
  0x25   :  { %1021 = vmatpush.msra.mxu0 %v954_v22  ;;  %v300_v15 = vld [vmem:[%s2612_s1 + $0xc0] sm:$0xff] }
  0x26   :  { %v44_v23 = vld [vmem:[%s2611_s0 + $0xc0] sm:$0xff] }
  0x27   :  { %1022 = vmatpush.msra.mxu0 %v953_v28 }
  0x29   :  { %1023 = vmatpush.msra.mxu0 %v952_v33 }
  0x2a   :  { %365 = vperm.xlu2 %1777, %v316_v25   ;;  %v986_v25 = vld [vmem:[%s2613_s2 + $0x130] sm:$0xff] }
  0x2b   :  { %77 = vperm.xlu1 %1776, %v28_v27   ;;  %362 = vperm.xlu0 %1775, %v315_v26   ;;  %v1002_v26 = vld [vmem:[%s2613_s2 + $0x1b0] sm:$0xff]  ;;  %v292_v27 = vld [vmem:[%s2612_s1 + $0x80] sm:$0xff] }
  0x2c   :  { %1247 = vmatpush.msra.mxu2 %v986_v25  ;;  %1360 = vmatpush.msra.mxu3 %v1002_v26  ;;  %v301_v25 = vld [vmem:[%s2612_s1 + $0xc8] sm:$0xff]  ;;  %v334_v26 = vadd.s32 256, %v302_v24 }
  0x2d   :  { %1024 = vmatpush.msra.mxu0 %v951_v39  ;;  %v333_v28 = vadd.s32 256, %v301_v25  ;;  %v49_v39 = vld [vmem:[%s2611_s0 + $0xe8] sm:$0xff] }
  0x2f   :  { %1025 = vmatpush.msra.mxu0 %v950_v43  ;;  %v306_v43 = vld [vmem:[%s2612_s1 + $0xf0] sm:$0xff] }
  0x32   :  { %83 = vperm.xlu2 %1777, %v30_v29   ;;  %v969_v29 = vld [vmem:[%s2613_s2 + $0xa8] sm:$0xff] }
  0x33   :  { %368 = vperm.xlu1 %1776, %v317_v30   ;;  %80 = vperm.xlu0 %1775, %v29_v31   ;;  %v985_v30 = vld [vmem:[%s2613_s2 + $0x128] sm:$0xff] }
  0x34   :  { %v1001_v31 = vld [vmem:[%s2613_s2 + $0x1a8] sm:$0xff]  ;;  %1135 = vmatpush.msra.mxu1 %v969_v29  ;;  %1248 = vmatpush.msra.mxu2 %v985_v30  ;;  %v303_v30 = vld [vmem:[%s2612_s1 + $0xd8] sm:$0xff] }
  0x35   :  { %1361 = vmatpush.msra.mxu3 %v1001_v31  ;;  %v335_v33 = vadd.s32 256, %v303_v30 }
  0x37   :  { %1362 = vmatpush.msra.mxu3 %v1000_v38 }
  0x39   :  { %1363 = vmatpush.msra.mxu3 %v999_v42 }
  0x3a   :  { %374 = vperm.xlu2 %1777, %v319_v34   ;;  %v968_v34 = vld [vmem:[%s2613_s2 + $0xa0] sm:$0xff] }
  0x3b   :  { %86 = vperm.xlu1 %1776, %v31_v36   ;;  %371 = vperm.xlu0 %1775, %v318_v35   ;;  %v324_v35 = vadd.s32 256, %v292_v27  ;;  %v984_v36 = vld [vmem:[%s2613_s2 + $0x120] sm:$0xff]  ;;  %v46_v27 = vld [vmem:[%s2611_s0 + $0xd0] sm:$0xff] }
  0x3c   :  { %1136 = vmatpush.msra.mxu1 %v968_v34  ;;  %1249 = vmatpush.msra.mxu2 %v984_v36  ;;  %v305_v36 = vld [vmem:[%s2612_s1 + $0xe8] sm:$0xff] }
  0x3d   :  { %v337_v38 = vadd.s32 256, %v305_v36 }
  0x3e   :  { %1137 = vmatpush.msra.mxu1 %v967_v40  ;;  %1250 = vmatpush.msra.mxu2 %v983_v41 }
  0x40   :  { %1138 = vmatpush.msra.mxu1 %v966_v45  ;;  %v51_v45 = vld [vmem:[%s2611_s0 + $0xf8] sm:$0xff] }
  0x42   :  { %92 = vperm.xlu2 %1777, %v33_v46   ;;  %v982_v46 = vld [vmem:[%s2613_s2 + $0x110] sm:$0xff]  ;;  %1139 = vmatpush.msra.mxu1 %v965_v49  ;;  %v307_v49 = vld [vmem:[%s2612_s1 + $0xf8] sm:$0xff] }
  0x43   :  { %377 = vperm.xlu1 %1776, %v320_v47   ;;  %89 = vperm.xlu0 %1775, %v32_v48   ;;  %v998_v47 = vld [vmem:[%s2613_s2 + $0x190] sm:$0xff]  ;;  %v949_v48 = vld [vmem:[%s2613_s2 + $0x8] sm:$0xff] }
  0x44   :  { %1251 = vmatpush.msra.mxu2 %v982_v46  ;;  %1364 = vmatpush.msra.mxu3 %v998_v47  ;;  %v338_v46 = vadd.s32 256, %v306_v43  ;;  %v50_v47 = vld [vmem:[%s2611_s0 + $0xf0] sm:$0xff] }
  0x45   :  { %1026 = vmatpush.msra.mxu0 %v949_v48  ;;  %1140 = vmatpush.msra.mxu1 %v964_v56 }
  0x46   :  { %1252 = vmatpush.msra.mxu2 %v981_v50  ;;  %1365 = vmatpush.msra.mxu3 %v997_v53 }
  0x47   :  { %1027 = vmatpush.msra.mxu0 %v948_v55 }
  0x48   :  { %1253 = vmatpush.msra.mxu2 %v980_v57  ;;  %1366 = vmatpush.msra.mxu3 %v996_v58 }
  0x4a   :  { %383 = vperm.xlu2 %1777, %v322_v60   ;;  %v295_v60 = vld [vmem:[%s2612_s1 + $0x98] sm:$0xff] }
  0x4b   :  { %95 = vperm.xlu1 %1776, %v34_v2   ;;  %380 = vperm.xlu0 %1775, %v321_v0   ;;  %v327_v62 = vadd.s32 256, %v295_v60  ;;  %v297_v0 = vld [vmem:[%s2612_s1 + $0xa8] sm:$0xff] }
  0x4c   :  { %v329_v2 = vadd.s32 256, %v297_v0 }
  0x52   :  { %101 = vperm.xlu2 %1777, %v36_v16  }
  0x53   :  { %386 = vperm.xlu1 %1776, %v323_v17   ;;  %98 = vperm.xlu0 %1775, %v35_v19   ;;  %v2177_v17 = vadd.s32 384, %v2162_v11  ;;  %v332_v19 = vadd.s32 256, %v300_v15 }
  0x5a   :  { %392 = vperm.xlu2 %1777, %v325_v32   ;;  %v48_v32 = vld [vmem:[%s2611_s0 + $0xe0] sm:$0xff] }
  0x5b   :  { %104 = vperm.xlu1 %1776, %v37_v37   ;;  %389 = vperm.xlu0 %1775, %v324_v35   ;;  %v47_v35 = vld [vmem:[%s2611_s0 + $0xd8] sm:$0xff]  ;;  %v304_v37 = vld [vmem:[%s2612_s1 + $0xe0] sm:$0xff]  ;;  %s1806_s0 = smov [#allocation2]  }
  0x5c   :  { %v60_v21 = vpop.permute.xlu2 %59  ;;  %v336_v40 = vadd.s32 256, %v304_v37  ;;  %s1500_s1 = sshll.u32 %s1806_s0, 4  ;;  %s1501_s1 = int_to_ptr.vmem [resolvable:$true] %s1500_s1 }
  0x62   :  { %110 = vperm.xlu2 %1777, %v39_v51   ;;  %v339_v51 = vadd.s32 256, %v307_v49 }
  0x63   :  { %395 = vperm.xlu1 %1776, %v326_v52   ;;  %107 = vperm.xlu0 %1775, %v38_v54  }
  0x64   :  { %v348_v29 = vpop.permute.xlu2 %347 }
  0x6a   :  { %401 = vperm.xlu2 %1777, %v328_v61  }
  0x6b   :  { %113 = vperm.xlu1 %1776, %v40_v63   ;;  %398 = vperm.xlu0 %1775, %v327_v62  }
  0x6c   :  { %v66_v42 = vpop.permute.xlu2 %65 }
  0x72   :  { %119 = vperm.xlu2 %1777, %v42_v1  }
  0x73   :  { %404 = vperm.xlu1 %1776, %v329_v2   ;;  %116 = vperm.xlu0 %1775, %v41_v3  }
  0x74   :  { %v357_v48 = vpop.permute.xlu2 %356 }
  0x75   :  { %v54_v7 = vpop.permute.xlu0 %53  ;;  %v57_v9 = vpop.permute.xlu1 %56 }
  0x76   :  { %vm148_vm0 = vcmp.eq.s32.totalorder %v2162_v11, %v54_v7  ;;  %vm149_vm5 = vcmp.eq.s32.totalorder %v2168_v13, %v54_v7  ;;  %vm150_vm8 = vcmp.eq.s32.totalorder %v2171_v14, %v54_v7  ;;  %vm151_vm10 = vcmp.eq.s32.totalorder %v2177_v17, %v54_v7 }
  0x77   :  { %vm152_vm12 = vcmp.eq.s32.totalorder %v2162_v11, %v57_v9  ;;  %vm153_vm14 = vcmp.eq.s32.totalorder %v2168_v13, %v57_v9 }
  0x7a   :  { %410 = vperm.xlu2 %1777, %v331_v8  }
  0x7b   :  { %122 = vperm.xlu1 %1776, %v43_v12   ;;  %407 = vperm.xlu0 %1775, %v330_v10  }
  0x7c   :  { %v75_v53 = vpop.permute.xlu2 %74 }
  0x7d   :  { %v342_v16 = vpop.permute.xlu0 %341  ;;  %v345_v22 = vpop.permute.xlu1 %344 }
  0x7e   :  { %vm436_vm1 = vcmp.eq.s32.totalorder %v2162_v11, %v342_v16  ;;  %vm437_vm2 = vcmp.eq.s32.totalorder %v2168_v13, %v342_v16  ;;  %vm438_vm3 = vcmp.eq.s32.totalorder %v2171_v14, %v342_v16  ;;  %vm439_vm6 = vcmp.eq.s32.totalorder %v2177_v17, %v342_v16 }
  0x7f   :  { %vm564_vm4 = vmor %vm148_vm0, %vm436_vm1  ;;  %vm440_vm13 = vcmp.eq.s32.totalorder %v2162_v11, %v345_v22  ;;  %vm441_vm15 = vcmp.eq.s32.totalorder %v2168_v13, %v345_v22  ;;  %vm154_vm0 = vcmp.eq.s32.totalorder %v2171_v14, %v57_v9  ;;  %vm442_vm1 = vcmp.eq.s32.totalorder %v2171_v14, %v345_v22 }
  0x80   :  { %1642 = vmatmul.msk.f32.vlgmr.msra.gmra.mxu0 %vm564_vm4, %v1805_v20  ;;  %vm565_vm7 = vmor %vm149_vm5, %vm437_vm2  ;;  %vm443_vm4 = vcmp.eq.s32.totalorder %v2177_v17, %v345_v22 }
  0x81   :  { %1674 = vmatmul.msk.f32.vlgmr.msra.gmra.mxu1 %vm565_vm7, %v1805_v20  ;;  %vm566_vm9 = vmor %vm150_vm8, %vm438_vm3  ;;  %vm155_vm3 = vcmp.eq.s32.totalorder %v2177_v17, %v57_v9  ;;  %vm156_vm8 = vcmp.eq.s32.totalorder %v2162_v11, %v60_v21 }
  0x82   :  { %1706 = vmatmul.msk.f32.vlgmr.msra.gmra.mxu2 %vm566_vm9, %v1805_v20  ;;  %vm567_vm11 = vmor %vm151_vm10, %vm439_vm6  ;;  %128 = vperm.xlu2 %1777, %v45_v18   ;;  %vm444_vm9 = vcmp.eq.s32.totalorder %v2162_v11, %v348_v29  ;;  %vm157_vm10 = vcmp.eq.s32.totalorder %v2168_v13, %v60_v21 }
  0x83   :  { %1738 = vmatmul.msk.f32.vlgmr.msra.gmra.mxu3 %vm567_vm11, %v1805_v20  ;;  %413 = vperm.xlu1 %1776, %v332_v19   ;;  %vm568_vm2 = vmor %vm152_vm12, %vm440_vm13  ;;  %vm445_vm11 = vcmp.eq.s32.totalorder %v2168_v13, %v348_v29  ;;  %vm158_vm12 = vcmp.eq.s32.totalorder %v2171_v14, %v60_v21  ;;  %vm446_vm13 = vcmp.eq.s32.totalorder %v2171_v14, %v348_v29 }
  0x84   :  { %125 = vperm.xlu0 %1775, %v44_v23   ;;  %vm569_vm5 = vmor %vm153_vm14, %vm441_vm15  ;;  %vm159_vm15 = vcmp.eq.s32.totalorder %v2177_v17, %v60_v21  ;;  %v366_v56 = vpop.permute.xlu2 %365 }
  0x85   :  { %vm570_vm6 = vmor %vm154_vm0, %vm442_vm1  ;;  %v63_v31 = vpop.permute.xlu0 %62  ;;  %vm447_vm0 = vcmp.eq.s32.totalorder %v2177_v17, %v348_v29  ;;  %v351_v34 = vpop.permute.xlu1 %350 }
  0x86   :  { %vm571_vm7 = vmor %vm155_vm3, %vm443_vm4  ;;  %vm160_vm4 = vcmp.eq.s32.totalorder %v2162_v11, %v63_v31 }
  0x87   :  { %vm572_vm14 = vmor %vm156_vm8, %vm444_vm9  ;;  %vm162_vm8 = vcmp.eq.s32.totalorder %v2171_v14, %v63_v31  ;;  %vm450_vm9 = vcmp.eq.s32.totalorder %v2171_v14, %v351_v34 }
  0x88   :  { %1643 = vmatmul.msk.f32.gmra.mxu0 %vm568_vm2, %v1805_v20  ;;  %vm573_vm1 = vmor %vm157_vm10, %vm445_vm11  ;;  %vm163_vm11 = vcmp.eq.s32.totalorder %v2177_v17, %v63_v31 }
  0x89   :  { %1675 = vmatmul.msk.f32.gmra.mxu1 %vm569_vm5, %v1805_v20  ;;  %vm574_vm2 = vmor %vm158_vm12, %vm446_vm13  ;;  %vm448_vm5 = vcmp.eq.s32.totalorder %v2162_v11, %v351_v34  ;;  %vm451_vm12 = vcmp.eq.s32.totalorder %v2177_v17, %v351_v34 }
  0x8a   :  { %1707 = vmatmul.msk.f32.gmra.mxu2 %vm570_vm6, %v1805_v20  ;;  %419 = vperm.xlu2 %1777, %v334_v26   ;;  %vm575_vm3 = vmor %vm159_vm15, %vm447_vm0  ;;  %vm161_vm6 = vcmp.eq.s32.totalorder %v2168_v13, %v63_v31 }
  0x8b   :  { %1739 = vmatmul.msk.f32.gmra.mxu3 %vm571_vm7, %v1805_v20  ;;  %131 = vperm.xlu1 %1776, %v46_v27   ;;  %vm449_vm7 = vcmp.eq.s32.totalorder %v2168_v13, %v351_v34  ;;  %vm576_vm10 = vmor %vm160_vm4, %vm448_vm5  ;;  %vm165_vm5 = vcmp.eq.s32.totalorder %v2168_v13, %v66_v42 }
  0x8c   :  { %416 = vperm.xlu0 %1775, %v333_v28   ;;  %vm577_vm13 = vmor %vm161_vm6, %vm449_vm7  ;;  %v84_v59 = vpop.permute.xlu2 %83 }
  0x8d   :  { %v354_v41 = vpop.permute.xlu0 %353  ;;  %vm579_vm15 = vmor %vm163_vm11, %vm451_vm12  ;;  %v69_v44 = vpop.permute.xlu1 %68 }
  0x8e   :  { %vm452_vm0 = vcmp.eq.s32.totalorder %v2162_v11, %v354_v41  ;;  %vm455_vm6 = vcmp.eq.s32.totalorder %v2177_v17, %v354_v41  ;;  %vm168_vm12 = vcmp.eq.s32.totalorder %v2162_v11, %v69_v44 }
  0x90   :  { %1644 = vmatmul.msk.f32.gmra.mxu0 %vm572_vm14, %v1805_v20  ;;  %vm578_vm14 = vmor %vm162_vm8, %vm450_vm9  ;;  %vm166_vm8 = vcmp.eq.s32.totalorder %v2171_v14, %v66_v42 }
  0x91   :  { %1676 = vmatmul.msk.f32.gmra.mxu1 %vm573_vm1, %v1805_v20  ;;  %vm453_vm1 = vcmp.eq.s32.totalorder %v2168_v13, %v354_v41 }
  0x92   :  { %1708 = vmatmul.msk.f32.gmra.mxu2 %vm574_vm2, %v1805_v20  ;;  %137 = vperm.xlu2 %1777, %v48_v32   ;;  %vm164_vm2 = vcmp.eq.s32.totalorder %v2162_v11, %v66_v42  ;;  %vm581_vm7 = vmor %vm165_vm5, %vm453_vm1  ;;  %vm457_vm1 = vcmp.eq.s32.totalorder %v2168_v13, %v357_v48 }
  0x93   :  { %1740 = vmatmul.msk.f32.gmra.mxu3 %vm575_vm3, %v1805_v20  ;;  %422 = vperm.xlu1 %1776, %v335_v33   ;;  %vm454_vm3 = vcmp.eq.s32.totalorder %v2171_v14, %v354_v41  ;;  %vm580_vm4 = vmor %vm164_vm2, %vm452_vm0  ;;  %vm171_vm2 = vcmp.eq.s32.totalorder %v2177_v17, %v69_v44 }
  0x94   :  { %134 = vperm.xlu0 %1775, %v47_v35   ;;  %vm582_vm9 = vmor %vm166_vm8, %vm454_vm3  ;;  %v375_v62 = vpop.permute.xlu2 %374 }
  0x95   :  { %v72_v50 = vpop.permute.xlu0 %71  ;;  %v360_v52 = vpop.permute.xlu1 %359 }
  0x96   :  { %vm172_vm8 = vcmp.eq.s32.totalorder %v2162_v11, %v72_v50 }
  0x98   :  { %1645 = vmatmul.msk.f32.gmra.mxu0 %vm576_vm10, %v1805_v20  ;;  %vm167_vm10 = vcmp.eq.s32.totalorder %v2177_v17, %v66_v42 }
  0x99   :  { %1677 = vmatmul.msk.f32.gmra.mxu1 %vm577_vm13, %v1805_v20  ;;  %vm583_vm11 = vmor %vm167_vm10, %vm455_vm6  ;;  %vm169_vm13 = vcmp.eq.s32.totalorder %v2168_v13, %v69_v44  ;;  %vm459_vm6 = vcmp.eq.s32.totalorder %v2177_v17, %v357_v48  ;;  %vm173_vm10 = vcmp.eq.s32.totalorder %v2168_v13, %v72_v50 }
  0x9a   :  { %1709 = vmatmul.msk.f32.gmra.mxu2 %vm578_vm14, %v1805_v20  ;;  %428 = vperm.xlu2 %1777, %v337_v38   ;;  %vm456_vm14 = vcmp.eq.s32.totalorder %v2162_v11, %v357_v48  ;;  %vm585_vm3 = vmor %vm169_vm13, %vm457_vm1  ;;  %vm462_vm13 = vcmp.eq.s32.totalorder %v2171_v14, %v360_v52 }
  0x9b   :  { %1741 = vmatmul.msk.f32.gmra.mxu3 %vm579_vm15, %v1805_v20  ;;  %140 = vperm.xlu1 %1776, %v49_v39   ;;  %vm170_vm15 = vcmp.eq.s32.totalorder %v2171_v14, %v69_v44  ;;  %vm584_vm0 = vmor %vm168_vm12, %vm456_vm14  ;;  %vm174_vm12 = vcmp.eq.s32.totalorder %v2171_v14, %v72_v50 }
  0x9c   :  { %425 = vperm.xlu0 %1775, %v336_v40   ;;  %v93_v1 = vpop.permute.xlu2 %92 }
  0x9d   :  { %v363_v54 = vpop.permute.xlu0 %362  ;;  %v78_v55 = vpop.permute.xlu1 %77 }
  0xa0   :  { %1646 = vmatmul.msk.f32.gmra.mxu0 %vm580_vm4, %v1805_v20  ;;  %vm458_vm4 = vcmp.eq.s32.totalorder %v2171_v14, %v357_v48 }
  0xa1   :  { %1678 = vmatmul.msk.f32.gmra.mxu1 %vm581_vm7, %v1805_v20  ;;  %vm586_vm5 = vmor %vm170_vm15, %vm458_vm4  ;;  %vm175_vm15 = vcmp.eq.s32.totalorder %v2177_v17, %v72_v50  ;;  %vm464_vm4 = vcmp.eq.s32.totalorder %v2162_v11, %v363_v54 }
  0xa2   :  { %1710 = vmatmul.msk.f32.gmra.mxu2 %vm582_vm9, %v1805_v20  ;;  %146 = vperm.xlu2 %1777, %v51_v45   ;;  %vm587_vm7 = vmor %vm171_vm2, %vm459_vm6  ;;  %vm460_vm9 = vcmp.eq.s32.totalorder %v2162_v11, %v360_v52  ;;  %vm176_vm6 = vcmp.eq.s32.totalorder %v2162_v11, %v75_v53 }
  0xa3   :  { %1742 = vmatmul.msk.f32.gmra.mxu3 %vm583_vm11, %v1805_v20  ;;  %431 = vperm.xlu1 %1776, %v338_v46   ;;  %vm461_vm11 = vcmp.eq.s32.totalorder %v2168_v13, %v360_v52  ;;  %vm588_vm14 = vmor %vm172_vm8, %vm460_vm9  ;;  %vm177_vm9 = vcmp.eq.s32.totalorder %v2168_v13, %v75_v53 }
  0xa4   :  { %143 = vperm.xlu0 %1775, %v50_v47   ;;  %vm589_vm1 = vmor %vm173_vm10, %vm461_vm11  ;;  %vm467_vm10 = vcmp.eq.s32.totalorder %v2177_v17, %v363_v54  ;;  %v384_v4 = vpop.permute.xlu2 %383 }
  0xa5   :  { %vm590_vm2 = vmor %vm174_vm12, %vm462_vm13  ;;  %vm178_vm12 = vcmp.eq.s32.totalorder %v2171_v14, %v75_v53  ;;  %v81_v57 = vpop.permute.xlu0 %80  ;;  %v369_v58 = vpop.permute.xlu1 %368 }
  0xa6   :  { %vm592_vm8 = vmor %vm176_vm6, %vm464_vm4  ;;  %vm183_vm6 = vcmp.eq.s32.totalorder %v2177_v17, %v78_v55 }
  0xa8   :  { %1647 = vmatmul.msk.f32.gmra.mxu0 %vm584_vm0, %v1805_v20  ;;  %vm463_vm0 = vcmp.eq.s32.totalorder %v2177_v17, %v360_v52 }
  0xa9   :  { %1679 = vmatmul.msk.f32.gmra.mxu1 %vm585_vm3, %v1805_v20  ;;  %vm591_vm3 = vmor %vm175_vm15, %vm463_vm0  ;;  %vm180_vm0 = vcmp.eq.s32.totalorder %v2162_v11, %v78_v55 }
  0xaa   :  { %1711 = vmatmul.msk.f32.gmra.mxu2 %vm586_vm5, %v1805_v20  ;;  %vm465_vm5 = vcmp.eq.s32.totalorder %v2168_v13, %v363_v54 }
  0xab   :  { %1743 = vmatmul.msk.f32.gmra.mxu3 %vm587_vm7, %v1805_v20  ;;  %vm466_vm7 = vcmp.eq.s32.totalorder %v2171_v14, %v363_v54  ;;  %vm593_vm11 = vmor %vm177_vm9, %vm465_vm5  ;;  %vm469_vm5 = vcmp.eq.s32.totalorder %v2168_v13, %v366_v56 }
  0xac   :  { %434 = vperm.xlu0 %1775, %v339_v51   ;;  %vm594_vm13 = vmor %vm178_vm12, %vm466_vm7  ;;  %vm184_vm12 = vcmp.eq.s32.totalorder %v2162_v11, %v81_v57  ;;  %v102_v7 = vpop.permute.xlu2 %101 }
  0xad   :  { %v372_v60 = vpop.permute.xlu0 %371  ;;  %v87_v61 = vpop.permute.xlu1 %86 }
  0xb0   :  { %1648 = vmatmul.msk.f32.gmra.mxu0 %vm588_vm14, %v1805_v20  ;;  %vm179_vm14 = vcmp.eq.s32.totalorder %v2177_v17, %v75_v53 }
  0xb1   :  { %1680 = vmatmul.msk.f32.gmra.mxu1 %vm589_vm1, %v1805_v20  ;;  %vm595_vm15 = vmor %vm179_vm14, %vm467_vm10  ;;  %vm181_vm1 = vcmp.eq.s32.totalorder %v2168_v13, %v78_v55  ;;  %vm471_vm10 = vcmp.eq.s32.totalorder %v2177_v17, %v366_v56  ;;  %vm185_vm14 = vcmp.eq.s32.totalorder %v2168_v13, %v81_v57 }
  0xb2   :  { %1712 = vmatmul.msk.f32.gmra.mxu2 %vm590_vm2, %v1805_v20  ;;  %vm468_vm2 = vcmp.eq.s32.totalorder %v2162_v11, %v366_v56  ;;  %vm597_vm7 = vmor %vm181_vm1, %vm469_vm5  ;;  %vm474_vm1 = vcmp.eq.s32.totalorder %v2171_v14, %v369_v58 }
  0xb3   :  { %1744 = vmatmul.msk.f32.gmra.mxu3 %vm591_vm3, %v1805_v20  ;;  %vm182_vm3 = vcmp.eq.s32.totalorder %v2171_v14, %v78_v55  ;;  %vm596_vm4 = vmor %vm180_vm0, %vm468_vm2  ;;  %vm186_vm0 = vcmp.eq.s32.totalorder %v2171_v14, %v81_v57 }
  0xb4   :  { %v393_v15 = vpop.permute.xlu2 %392 }
  0xb5   :  { %v90_v63 = vpop.permute.xlu0 %89  ;;  %v378_v0 = vpop.permute.xlu1 %377 }
  0xb8   :  { %1649 = vmatmul.msk.f32.gmra.mxu0 %vm592_vm8, %v1805_v20  ;;  %vm470_vm8 = vcmp.eq.s32.totalorder %v2171_v14, %v366_v56 }
  0xb9   :  { %1681 = vmatmul.msk.f32.gmra.mxu1 %vm593_vm11, %v1805_v20  ;;  %vm598_vm9 = vmor %vm182_vm3, %vm470_vm8  ;;  %vm187_vm3 = vcmp.eq.s32.totalorder %v2177_v17, %v81_v57  ;;  %vm476_vm8 = vcmp.eq.s32.totalorder %v2162_v11, %v372_v60 }
  0xba   :  { %1713 = vmatmul.msk.f32.gmra.mxu2 %vm594_vm13, %v1805_v20  ;;  %vm599_vm11 = vmor %vm183_vm6, %vm471_vm10  ;;  %vm472_vm13 = vcmp.eq.s32.totalorder %v2162_v11, %v369_v58  ;;  %vm188_vm10 = vcmp.eq.s32.totalorder %v2162_v11, %v84_v59 }
  0xbb   :  { %1745 = vmatmul.msk.f32.gmra.mxu3 %vm595_vm15, %v1805_v20  ;;  %vm473_vm15 = vcmp.eq.s32.totalorder %v2168_v13, %v369_v58  ;;  %vm600_vm2 = vmor %vm184_vm12, %vm472_vm13  ;;  %vm189_vm13 = vcmp.eq.s32.totalorder %v2168_v13, %v84_v59 }
  0xbc   :  { %vm601_vm5 = vmor %vm185_vm14, %vm473_vm15  ;;  %vm479_vm14 = vcmp.eq.s32.totalorder %v2177_v17, %v372_v60  ;;  %v111_v34 = vpop.permute.xlu2 %110 }
  0xbd   :  { %vm602_vm6 = vmor %vm186_vm0, %vm474_vm1  ;;  %vm190_vm0 = vcmp.eq.s32.totalorder %v2171_v14, %v84_v59  ;;  %v381_v2 = vpop.permute.xlu0 %380  ;;  %v96_v3 = vpop.permute.xlu1 %95 }
  0xbe   :  { %vm604_vm12 = vmor %vm188_vm10, %vm476_vm8  ;;  %vm195_vm10 = vcmp.eq.s32.totalorder %v2177_v17, %v87_v61 }
  0xc0   :  { %1650 = vmatmul.msk.f32.gmra.mxu0 %vm596_vm4, %v1805_v20  ;;  %vm475_vm4 = vcmp.eq.s32.totalorder %v2177_v17, %v369_v58 }
  0xc1   :  { %1682 = vmatmul.msk.f32.gmra.mxu1 %vm597_vm7, %v1805_v20  ;;  %vm603_vm7 = vmor %vm187_vm3, %vm475_vm4  ;;  %vm192_vm4 = vcmp.eq.s32.totalorder %v2162_v11, %v87_v61 }
  0xc2   :  { %1714 = vmatmul.msk.f32.gmra.mxu2 %vm598_vm9, %v1805_v20  ;;  %vm477_vm9 = vcmp.eq.s32.totalorder %v2168_v13, %v372_v60 }
  0xc3   :  { %1746 = vmatmul.msk.f32.gmra.mxu3 %vm599_vm11, %v1805_v20  ;;  %vm478_vm11 = vcmp.eq.s32.totalorder %v2171_v14, %v372_v60  ;;  %vm605_vm15 = vmor %vm189_vm13, %vm477_vm9  ;;  %vm481_vm9 = vcmp.eq.s32.totalorder %v2168_v13, %v375_v62 }
  0xc4   :  { %vm606_vm1 = vmor %vm190_vm0, %vm478_vm11  ;;  %vm196_vm0 = vcmp.eq.s32.totalorder %v2162_v11, %v90_v63  ;;  %v402_v44 = vpop.permute.xlu2 %401 }
  0xc5   :  { %v99_v5 = vpop.permute.xlu0 %98  ;;  %v387_v6 = vpop.permute.xlu1 %386 }
  0xc8   :  { %1651 = vmatmul.msk.f32.gmra.mxu0 %vm600_vm2, %v1805_v20  ;;  %vm191_vm2 = vcmp.eq.s32.totalorder %v2177_v17, %v84_v59 }
  0xc9   :  { %1683 = vmatmul.msk.f32.gmra.mxu1 %vm601_vm5, %v1805_v20  ;;  %vm607_vm3 = vmor %vm191_vm2, %vm479_vm14  ;;  %vm193_vm5 = vcmp.eq.s32.totalorder %v2168_v13, %v87_v61  ;;  %vm483_vm14 = vcmp.eq.s32.totalorder %v2177_v17, %v375_v62  ;;  %vm197_vm2 = vcmp.eq.s32.totalorder %v2168_v13, %v90_v63 }
  0xca   :  { %1715 = vmatmul.msk.f32.gmra.mxu2 %vm602_vm6, %v1805_v20  ;;  %vm480_vm6 = vcmp.eq.s32.totalorder %v2162_v11, %v375_v62  ;;  %vm609_vm11 = vmor %vm193_vm5, %vm481_vm9  ;;  %vm486_vm5 = vcmp.eq.s32.totalorder %v2171_v14, %v378_v0 }
  0xcb   :  { %1747 = vmatmul.msk.f32.gmra.mxu3 %vm603_vm7, %v1805_v20  ;;  %vm194_vm7 = vcmp.eq.s32.totalorder %v2171_v14, %v87_v61  ;;  %vm608_vm8 = vmor %vm192_vm4, %vm480_vm6  ;;  %vm198_vm4 = vcmp.eq.s32.totalorder %v2171_v14, %v90_v63 }
  0xcc   :  { %v120_v61 = vpop.permute.xlu2 %119 }
  0xcd   :  { %v390_v8 = vpop.permute.xlu0 %389  ;;  %v105_v12 = vpop.permute.xlu1 %104 }
  0xd0   :  { %1652 = vmatmul.msk.f32.gmra.mxu0 %vm604_vm12, %v1805_v20  ;;  %vm482_vm12 = vcmp.eq.s32.totalorder %v2171_v14, %v375_v62 }
  0xd1   :  { %1684 = vmatmul.msk.f32.gmra.mxu1 %vm605_vm15, %v1805_v20  ;;  %vm610_vm13 = vmor %vm194_vm7, %vm482_vm12  ;;  %vm199_vm7 = vcmp.eq.s32.totalorder %v2177_v17, %v90_v63  ;;  %vm488_vm12 = vcmp.eq.s32.totalorder %v2162_v11, %v381_v2 }
  0xd2   :  { %1716 = vmatmul.msk.f32.gmra.mxu2 %vm606_vm1, %v1805_v20  ;;  %vm611_vm15 = vmor %vm195_vm10, %vm483_vm14  ;;  %vm484_vm1 = vcmp.eq.s32.totalorder %v2162_v11, %v378_v0  ;;  %vm200_vm14 = vcmp.eq.s32.totalorder %v2162_v11, %v93_v1 }
  0xd3   :  { %1748 = vmatmul.msk.f32.gmra.mxu3 %vm607_vm3, %v1805_v20  ;;  %vm485_vm3 = vcmp.eq.s32.totalorder %v2168_v13, %v378_v0  ;;  %vm612_vm6 = vmor %vm196_vm0, %vm484_vm1  ;;  %vm201_vm1 = vcmp.eq.s32.totalorder %v2168_v13, %v93_v1 }
  0xd4   :  { %vm613_vm9 = vmor %vm197_vm2, %vm485_vm3  ;;  %vm491_vm2 = vcmp.eq.s32.totalorder %v2177_v17, %v381_v2 }
  0xd5   :  { %vm614_vm10 = vmor %vm198_vm4, %vm486_vm5  ;;  %vm202_vm4 = vcmp.eq.s32.totalorder %v2171_v14, %v93_v1  ;;  %v108_v19 = vpop.permute.xlu0 %107  ;;  %v396_v26 = vpop.permute.xlu1 %395 }
  0xd6   :  { %vm616_vm0 = vmor %vm200_vm14, %vm488_vm12  ;;  %vm207_vm14 = vcmp.eq.s32.totalorder %v2177_v17, %v96_v3 }
  0xd8   :  { %1653 = vmatmul.msk.f32.gmra.mxu0 %vm608_vm8, %v1805_v20  ;;  %vm487_vm8 = vcmp.eq.s32.totalorder %v2177_v17, %v378_v0 }
  0xd9   :  { %1685 = vmatmul.msk.f32.gmra.mxu1 %vm609_vm11, %v1805_v20  ;;  %vm615_vm11 = vmor %vm199_vm7, %vm487_vm8  ;;  %vm204_vm8 = vcmp.eq.s32.totalorder %v2162_v11, %v96_v3 }
  0xda   :  { %1717 = vmatmul.msk.f32.gmra.mxu2 %vm610_vm13, %v1805_v20  ;;  %vm489_vm13 = vcmp.eq.s32.totalorder %v2168_v13, %v381_v2 }
  0xdb   :  { %1749 = vmatmul.msk.f32.gmra.mxu3 %vm611_vm15, %v1805_v20  ;;  %vm490_vm15 = vcmp.eq.s32.totalorder %v2171_v14, %v381_v2  ;;  %vm617_vm3 = vmor %vm201_vm1, %vm489_vm13  ;;  %vm493_vm13 = vcmp.eq.s32.totalorder %v2168_v13, %v384_v4 }
  0xdc   :  { %vm618_vm5 = vmor %vm202_vm4, %vm490_vm15  ;;  %vm208_vm4 = vcmp.eq.s32.totalorder %v2162_v11, %v99_v5 }
  0xdd   :  { %v399_v35 = vpop.permute.xlu0 %398  ;;  %v114_v38 = vpop.permute.xlu1 %113 }
  0xe0   :  { %1654 = vmatmul.msk.f32.gmra.mxu0 %vm612_vm6, %v1805_v20  ;;  %vm203_vm6 = vcmp.eq.s32.totalorder %v2177_v17, %v93_v1 }
  0xe1   :  { %1686 = vmatmul.msk.f32.gmra.mxu1 %vm613_vm9, %v1805_v20  ;;  %vm619_vm7 = vmor %vm203_vm6, %vm491_vm2  ;;  %vm205_vm9 = vcmp.eq.s32.totalorder %v2168_v13, %v96_v3  ;;  %vm495_vm2 = vcmp.eq.s32.totalorder %v2177_v17, %v384_v4  ;;  %vm209_vm6 = vcmp.eq.s32.totalorder %v2168_v13, %v99_v5 }
  0xe2   :  { %1718 = vmatmul.msk.f32.gmra.mxu2 %vm614_vm10, %v1805_v20  ;;  %vm492_vm10 = vcmp.eq.s32.totalorder %v2162_v11, %v384_v4  ;;  %vm621_vm15 = vmor %vm205_vm9, %vm493_vm13  ;;  %vm498_vm9 = vcmp.eq.s32.totalorder %v2171_v14, %v387_v6 }
  0xe3   :  { %1750 = vmatmul.msk.f32.gmra.mxu3 %vm615_vm11, %v1805_v20  ;;  %vm206_vm11 = vcmp.eq.s32.totalorder %v2171_v14, %v96_v3  ;;  %vm620_vm12 = vmor %vm204_vm8, %vm492_vm10  ;;  %vm210_vm8 = vcmp.eq.s32.totalorder %v2171_v14, %v99_v5 }
  0xe5   :  { %v117_v47 = vpop.permute.xlu0 %116  ;;  %v405_v53 = vpop.permute.xlu1 %404 }
  0xe8   :  { %1655 = vmatmul.msk.f32.gmra.mxu0 %vm616_vm0, %v1805_v20  ;;  %vm494_vm0 = vcmp.eq.s32.totalorder %v2171_v14, %v384_v4 }
  0xe9   :  { %1687 = vmatmul.msk.f32.gmra.mxu1 %vm617_vm3, %v1805_v20  ;;  %vm622_vm1 = vmor %vm206_vm11, %vm494_vm0  ;;  %vm211_vm11 = vcmp.eq.s32.totalorder %v2177_v17, %v99_v5  ;;  %vm500_vm0 = vcmp.eq.s32.totalorder %v2162_v11, %v390_v8 }
  0xea   :  { %1719 = vmatmul.msk.f32.gmra.mxu2 %vm618_vm5, %v1805_v20  ;;  %vm623_vm3 = vmor %vm207_vm14, %vm495_vm2  ;;  %vm496_vm5 = vcmp.eq.s32.totalorder %v2162_v11, %v387_v6  ;;  %vm212_vm2 = vcmp.eq.s32.totalorder %v2162_v11, %v102_v7 }
  0xeb   :  { %1751 = vmatmul.msk.f32.gmra.mxu3 %vm619_vm7, %v1805_v20  ;;  %vm497_vm7 = vcmp.eq.s32.totalorder %v2168_v13, %v387_v6  ;;  %vm624_vm10 = vmor %vm208_vm4, %vm496_vm5  ;;  %vm213_vm5 = vcmp.eq.s32.totalorder %v2168_v13, %v102_v7 }
  0xec   :  { %vm625_vm13 = vmor %vm209_vm6, %vm497_vm7  ;;  %vm503_vm6 = vcmp.eq.s32.totalorder %v2177_v17, %v390_v8 }
  0xed   :  { %vm626_vm14 = vmor %vm210_vm8, %vm498_vm9  ;;  %vm214_vm8 = vcmp.eq.s32.totalorder %v2171_v14, %v102_v7  ;;  %v408_v62 = vpop.permute.xlu0 %407  ;;  %v123_v1 = vpop.permute.xlu1 %122 }
  0xee   :  { %vm628_vm4 = vmor %vm212_vm2, %vm500_vm0  ;;  %vm219_vm2 = vcmp.eq.s32.totalorder %v2177_v17, %v105_v12 }
  0xf0   :  { %1656 = vmatmul.msk.f32.gmra.mxu0 %vm620_vm12, %v1805_v20  ;;  %vm499_vm12 = vcmp.eq.s32.totalorder %v2177_v17, %v387_v6 }
  0xf1   :  { %1688 = vmatmul.msk.f32.gmra.mxu1 %vm621_vm15, %v1805_v20  ;;  %vm627_vm15 = vmor %vm211_vm11, %vm499_vm12  ;;  %vm216_vm12 = vcmp.eq.s32.totalorder %v2162_v11, %v105_v12 }
  0xf2   :  { %1720 = vmatmul.msk.f32.gmra.mxu2 %vm622_vm1, %v1805_v20  ;;  %vm501_vm1 = vcmp.eq.s32.totalorder %v2168_v13, %v390_v8 }
  0xf3   :  { %1752 = vmatmul.msk.f32.gmra.mxu3 %vm623_vm3, %v1805_v20  ;;  %vm502_vm3 = vcmp.eq.s32.totalorder %v2171_v14, %v390_v8  ;;  %vm629_vm7 = vmor %vm213_vm5, %vm501_vm1  ;;  %vm505_vm1 = vcmp.eq.s32.totalorder %v2168_v13, %v393_v15 }
  0xf4   :  { %vm630_vm9 = vmor %vm214_vm8, %vm502_vm3  ;;  %vm220_vm8 = vcmp.eq.s32.totalorder %v2162_v11, %v108_v19 }
  0xf8   :  { %1657 = vmatmul.msk.f32.gmra.mxu0 %vm624_vm10, %v1805_v20  ;;  %vm215_vm10 = vcmp.eq.s32.totalorder %v2177_v17, %v102_v7  ;;  %v411_v7 = vpop.permute.xlu2 %410 }
  0xf9   :  { %1689 = vmatmul.msk.f32.gmra.mxu1 %vm625_vm13, %v1805_v20  ;;  %vm631_vm11 = vmor %vm215_vm10, %vm503_vm6  ;;  %vm217_vm13 = vcmp.eq.s32.totalorder %v2168_v13, %v105_v12  ;;  %vm507_vm6 = vcmp.eq.s32.totalorder %v2177_v17, %v393_v15  ;;  %vm221_vm10 = vcmp.eq.s32.totalorder %v2168_v13, %v108_v19 }
  0xfa   :  { %1721 = vmatmul.msk.f32.gmra.mxu2 %vm626_vm14, %v1805_v20  ;;  %vm504_vm14 = vcmp.eq.s32.totalorder %v2162_v11, %v393_v15  ;;  %vm633_vm3 = vmor %vm217_vm13, %vm505_vm1  ;;  %vm510_vm13 = vcmp.eq.s32.totalorder %v2171_v14, %v396_v26 }
  0xfb   :  { %1753 = vmatmul.msk.f32.gmra.mxu3 %vm627_vm15, %v1805_v20  ;;  %vm218_vm15 = vcmp.eq.s32.totalorder %v2171_v14, %v105_v12  ;;  %vm632_vm0 = vmor %vm216_vm12, %vm504_vm14  ;;  %vm222_vm12 = vcmp.eq.s32.totalorder %v2171_v14, %v108_v19 }
  0xfd   :  { %v1029_v9 = vpop.f32.mrf.mxu0 }
  0xfe   :  { %v1142_v10 = vpop.f32.mrf.mxu1 }
  0xff   :  { %v1143_v16 = vadd.f32 %v1142_v10, %v1029_v9  ;;  %v126_v10 = vpop.permute.xlu0 %125 }
 0x100   :  { %1658 = vmatmul.msk.f32.gmra.mxu0 %vm628_vm4, %v1805_v20  ;;  %vm506_vm4 = vcmp.eq.s32.totalorder %v2171_v14, %v393_v15 }
 0x101   :  { %1690 = vmatmul.msk.f32.gmra.mxu1 %vm629_vm7, %v1805_v20  ;;  %vm634_vm5 = vmor %vm218_vm15, %vm506_vm4  ;;  %vm223_vm15 = vcmp.eq.s32.totalorder %v2177_v17, %v108_v19  ;;  %vm512_vm4 = vcmp.eq.s32.totalorder %v2162_v11, %v399_v35 }
 0x102   :  { %1722 = vmatmul.msk.f32.gmra.mxu2 %vm630_vm9, %v1805_v20  ;;  %vm635_vm7 = vmor %vm219_vm2, %vm507_vm6  ;;  %vm508_vm9 = vcmp.eq.s32.totalorder %v2162_v11, %v396_v26  ;;  %vm224_vm6 = vcmp.eq.s32.totalorder %v2162_v11, %v111_v34 }
 0x103   :  { %1754 = vmatmul.msk.f32.gmra.mxu3 %vm631_vm11, %v1805_v20  ;;  %vm509_vm11 = vcmp.eq.s32.totalorder %v2168_v13, %v396_v26  ;;  %vm636_vm14 = vmor %vm220_vm8, %vm508_vm9  ;;  %vm225_vm9 = vcmp.eq.s32.totalorder %v2168_v13, %v111_v34 }
 0x104   :  { %vm637_vm1 = vmor %vm221_vm10, %vm509_vm11  ;;  %vm515_vm10 = vcmp.eq.s32.totalorder %v2177_v17, %v399_v35 }
 0x105   :  { %v1255_v18 = vpop.f32.mrf.mxu2  ;;  %v1032_v23 = vpop.f32.mrf.mxu0  ;;  %vm638_vm2 = vmor %vm222_vm12, %vm510_vm13  ;;  %vm226_vm12 = vcmp.eq.s32.totalorder %v2171_v14, %v111_v34 }
 0x106   :  { %v1256_v21 = vadd.f32 %v1255_v18, %v1143_v16  ;;  %v1368_v22 = vpop.f32.mrf.mxu3  ;;  %v1145_v24 = vpop.f32.mrf.mxu1  ;;  %vm640_vm8 = vmor %vm224_vm6, %vm512_vm4  ;;  %vm231_vm6 = vcmp.eq.s32.totalorder %v2177_v17, %v114_v38 }
 0x107   :  { %v1146_v27 = vadd.f32 %v1145_v24, %v1032_v23 }
 0x108   :  { %v1369_v25 = vadd.f32 %v1368_v22, %v1256_v21  ;;  %1659 = vmatmul.msk.f32.gmra.mxu0 %vm632_vm0, %v1805_v20  ;;  %vm511_vm0 = vcmp.eq.s32.totalorder %v2177_v17, %v396_v26  ;;  %v414_v21 = vpop.permute.xlu1 %413 }
 0x109   :  { %1691 = vmatmul.msk.f32.gmra.mxu1 %vm633_vm3, %v1805_v20  ;;  %vm639_vm3 = vmor %vm223_vm15, %vm511_vm0  ;;  %vm228_vm0 = vcmp.eq.s32.totalorder %v2162_v11, %v114_v38 }
 0x10a   :  { %1464 = vst [vmem:[#allocation2] sm:$0xff] %v1369_v25  ;;  %1723 = vmatmul.msk.f32.gmra.mxu2 %vm634_vm5, %v1805_v20  ;;  %vm513_vm5 = vcmp.eq.s32.totalorder %v2168_v13, %v399_v35 }
 0x10b   :  { %1755 = vmatmul.msk.f32.gmra.mxu3 %vm635_vm7, %v1805_v20  ;;  %vm514_vm7 = vcmp.eq.s32.totalorder %v2171_v14, %v399_v35  ;;  %vm641_vm11 = vmor %vm225_vm9, %vm513_vm5  ;;  %vm517_vm5 = vcmp.eq.s32.totalorder %v2168_v13, %v402_v44 }
 0x10c   :  { %vm642_vm13 = vmor %vm226_vm12, %vm514_vm7  ;;  %vm232_vm12 = vcmp.eq.s32.totalorder %v2162_v11, %v117_v47 }
 0x10d   :  { %v1258_v28 = vpop.f32.mrf.mxu2  ;;  %v1035_v31 = vpop.f32.mrf.mxu0 }
 0x10e   :  { %v1259_v29 = vadd.f32 %v1258_v28, %v1146_v27  ;;  %v1371_v30 = vpop.f32.mrf.mxu3  ;;  %v1148_v32 = vpop.f32.mrf.mxu1 }
 0x10f   :  { %v1149_v36 = vadd.f32 %v1148_v32, %v1035_v31 }
 0x110   :  { %v1372_v33 = vadd.f32 %v1371_v30, %v1259_v29  ;;  %1660 = vmatmul.msk.f32.gmra.mxu0 %vm636_vm14, %v1805_v20  ;;  %vm227_vm14 = vcmp.eq.s32.totalorder %v2177_v17, %v111_v34  ;;  %v129_v29 = vpop.permute.xlu2 %128  ;;  %v417_v30 = vpop.permute.xlu0 %416 }
 0x111   :  { %1692 = vmatmul.msk.f32.gmra.mxu1 %vm637_vm1, %v1805_v20  ;;  %vm643_vm15 = vmor %vm227_vm14, %vm515_vm10  ;;  %vm229_vm1 = vcmp.eq.s32.totalorder %v2168_v13, %v114_v38  ;;  %vm519_vm10 = vcmp.eq.s32.totalorder %v2177_v17, %v402_v44  ;;  %vm233_vm14 = vcmp.eq.s32.totalorder %v2168_v13, %v117_v47 }
 0x112   :  { %1465 = vst [vmem:[#allocation2 + $0x8] sm:$0xff] %v1372_v33  ;;  %1724 = vmatmul.msk.f32.gmra.mxu2 %vm638_vm2, %v1805_v20  ;;  %vm516_vm2 = vcmp.eq.s32.totalorder %v2162_v11, %v402_v44  ;;  %vm645_vm7 = vmor %vm229_vm1, %vm517_vm5  ;;  %vm522_vm1 = vcmp.eq.s32.totalorder %v2171_v14, %v405_v53  ;;  %v132_v33 = vpop.permute.xlu1 %131 }
 0x113   :  { %1756 = vmatmul.msk.f32.gmra.mxu3 %vm639_vm3, %v1805_v20  ;;  %vm230_vm3 = vcmp.eq.s32.totalorder %v2171_v14, %v114_v38  ;;  %vm644_vm4 = vmor %vm228_vm0, %vm516_vm2  ;;  %vm234_vm0 = vcmp.eq.s32.totalorder %v2171_v14, %v117_v47 }
 0x115   :  { %v1261_v37 = vpop.f32.mrf.mxu2  ;;  %v1038_v41 = vpop.f32.mrf.mxu0 }
 0x116   :  { %v1262_v39 = vadd.f32 %v1261_v37, %v1149_v36  ;;  %v1374_v40 = vpop.f32.mrf.mxu3  ;;  %v1151_v42 = vpop.f32.mrf.mxu1 }
 0x117   :  { %v1152_v45 = vadd.f32 %v1151_v42, %v1038_v41 }
 0x118   :  { %v1375_v43 = vadd.f32 %v1374_v40, %v1262_v39  ;;  %1661 = vmatmul.msk.f32.gmra.mxu0 %vm640_vm8, %v1805_v20  ;;  %vm518_vm8 = vcmp.eq.s32.totalorder %v2171_v14, %v402_v44  ;;  %v420_v39 = vpop.permute.xlu2 %419  ;;  %v135_v42 = vpop.permute.xlu0 %134 }
 0x119   :  { %1693 = vmatmul.msk.f32.gmra.mxu1 %vm641_vm11, %v1805_v20  ;;  %vm646_vm9 = vmor %vm230_vm3, %vm518_vm8  ;;  %vm235_vm3 = vcmp.eq.s32.totalorder %v2177_v17, %v117_v47  ;;  %vm524_vm8 = vcmp.eq.s32.totalorder %v2162_v11, %v408_v62 }
 0x11a   :  { %1466 = vst [vmem:[#allocation2 + $0x10] sm:$0xff] %v1375_v43  ;;  %1725 = vmatmul.msk.f32.gmra.mxu2 %vm642_vm13, %v1805_v20  ;;  %vm647_vm11 = vmor %vm231_vm6, %vm519_vm10  ;;  %vm520_vm13 = vcmp.eq.s32.totalorder %v2162_v11, %v405_v53  ;;  %vm236_vm10 = vcmp.eq.s32.totalorder %v2162_v11, %v120_v61 }
 0x11b   :  { %1757 = vmatmul.msk.f32.gmra.mxu3 %vm643_vm15, %v1805_v20  ;;  %vm521_vm15 = vcmp.eq.s32.totalorder %v2168_v13, %v405_v53  ;;  %vm648_vm2 = vmor %vm232_vm12, %vm520_vm13  ;;  %vm237_vm13 = vcmp.eq.s32.totalorder %v2168_v13, %v120_v61 }
 0x11c   :  { %vm649_vm5 = vmor %vm233_vm14, %vm521_vm15  ;;  %vm527_vm14 = vcmp.eq.s32.totalorder %v2177_v17, %v408_v62 }
 0x11d   :  { %v1264_v46 = vpop.f32.mrf.mxu2  ;;  %v1041_v50 = vpop.f32.mrf.mxu0  ;;  %vm650_vm6 = vmor %vm234_vm0, %vm522_vm1  ;;  %vm238_vm0 = vcmp.eq.s32.totalorder %v2171_v14, %v120_v61 }
 0x11e   :  { %v1265_v48 = vadd.f32 %v1264_v46, %v1152_v45  ;;  %v1377_v49 = vpop.f32.mrf.mxu3  ;;  %v1154_v51 = vpop.f32.mrf.mxu1  ;;  %vm652_vm12 = vmor %vm236_vm10, %vm524_vm8  ;;  %vm243_vm10 = vcmp.eq.s32.totalorder %v2177_v17, %v123_v1 }
 0x11f   :  { %v1155_v54 = vadd.f32 %v1154_v51, %v1041_v50 }
 0x120   :  { %v1378_v52 = vadd.f32 %v1377_v49, %v1265_v48  ;;  %1662 = vmatmul.msk.f32.gmra.mxu0 %vm644_vm4, %v1805_v20  ;;  %vm523_vm4 = vcmp.eq.s32.totalorder %v2177_v17, %v405_v53  ;;  %v423_v48 = vpop.permute.xlu1 %422 }
 0x121   :  { %1694 = vmatmul.msk.f32.gmra.mxu1 %vm645_vm7, %v1805_v20  ;;  %vm651_vm7 = vmor %vm235_vm3, %vm523_vm4  ;;  %vm240_vm4 = vcmp.eq.s32.totalorder %v2162_v11, %v123_v1 }
 0x122   :  { %1467 = vst [vmem:[#allocation2 + $0x18] sm:$0xff] %v1378_v52  ;;  %1726 = vmatmul.msk.f32.gmra.mxu2 %vm646_vm9, %v1805_v20  ;;  %vm525_vm9 = vcmp.eq.s32.totalorder %v2168_v13, %v408_v62 }
 0x123   :  { %1758 = vmatmul.msk.f32.gmra.mxu3 %vm647_vm11, %v1805_v20  ;;  %vm526_vm11 = vcmp.eq.s32.totalorder %v2171_v14, %v408_v62  ;;  %vm653_vm15 = vmor %vm237_vm13, %vm525_vm9  ;;  %vm529_vm9 = vcmp.eq.s32.totalorder %v2168_v13, %v411_v7 }
 0x124   :  { %vm654_vm1 = vmor %vm238_vm0, %vm526_vm11  ;;  %vm244_vm0 = vcmp.eq.s32.totalorder %v2162_v11, %v126_v10 }
 0x125   :  { %v1267_v55 = vpop.f32.mrf.mxu2  ;;  %v1044_v58 = vpop.f32.mrf.mxu0 }
 0x126   :  { %v1268_v56 = vadd.f32 %v1267_v55, %v1155_v54  ;;  %v1380_v57 = vpop.f32.mrf.mxu3  ;;  %v1157_v59 = vpop.f32.mrf.mxu1 }
 0x127   :  { %v1158_v63 = vadd.f32 %v1157_v59, %v1044_v58 }
 0x128   :  { %v1381_v60 = vadd.f32 %v1380_v57, %v1268_v56  ;;  %1663 = vmatmul.msk.f32.gmra.mxu0 %vm648_vm2, %v1805_v20  ;;  %vm239_vm2 = vcmp.eq.s32.totalorder %v2177_v17, %v120_v61  ;;  %v138_v56 = vpop.permute.xlu2 %137  ;;  %v426_v57 = vpop.permute.xlu0 %425 }
 0x129   :  { %1695 = vmatmul.msk.f32.gmra.mxu1 %vm649_vm5, %v1805_v20  ;;  %vm655_vm3 = vmor %vm239_vm2, %vm527_vm14  ;;  %vm241_vm5 = vcmp.eq.s32.totalorder %v2168_v13, %v123_v1  ;;  %vm531_vm14 = vcmp.eq.s32.totalorder %v2177_v17, %v411_v7  ;;  %vm245_vm2 = vcmp.eq.s32.totalorder %v2168_v13, %v126_v10 }
 0x12a   :  { %1468 = vst [vmem:[#allocation2 + $0x20] sm:$0xff] %v1381_v60  ;;  %1727 = vmatmul.msk.f32.gmra.mxu2 %vm650_vm6, %v1805_v20  ;;  %vm528_vm6 = vcmp.eq.s32.totalorder %v2162_v11, %v411_v7  ;;  %vm657_vm11 = vmor %vm241_vm5, %vm529_vm9  ;;  %vm534_vm5 = vcmp.eq.s32.totalorder %v2171_v14, %v414_v21  ;;  %v141_v60 = vpop.permute.xlu1 %140 }
 0x12b   :  { %1759 = vmatmul.msk.f32.gmra.mxu3 %vm651_vm7, %v1805_v20  ;;  %vm242_vm7 = vcmp.eq.s32.totalorder %v2171_v14, %v123_v1  ;;  %vm656_vm8 = vmor %vm240_vm4, %vm528_vm6  ;;  %vm246_vm4 = vcmp.eq.s32.totalorder %v2171_v14, %v126_v10 }
 0x12d   :  { %v1270_v0 = vpop.f32.mrf.mxu2  ;;  %v1047_v4 = vpop.f32.mrf.mxu0 }
 0x12e   :  { %v1271_v2 = vadd.f32 %v1270_v0, %v1158_v63  ;;  %v1383_v3 = vpop.f32.mrf.mxu3  ;;  %v1160_v5 = vpop.f32.mrf.mxu1 }
 0x12f   :  { %v1161_v8 = vadd.f32 %v1160_v5, %v1047_v4 }
 0x130   :  { %v1384_v6 = vadd.f32 %v1383_v3, %v1271_v2  ;;  %1664 = vmatmul.msk.f32.gmra.mxu0 %vm652_vm12, %v1805_v20  ;;  %vm530_vm12 = vcmp.eq.s32.totalorder %v2171_v14, %v411_v7  ;;  %v429_v2 = vpop.permute.xlu2 %428  ;;  %v144_v5 = vpop.permute.xlu0 %143 }
 0x131   :  { %1696 = vmatmul.msk.f32.gmra.mxu1 %vm653_vm15, %v1805_v20  ;;  %vm658_vm13 = vmor %vm242_vm7, %vm530_vm12  ;;  %vm247_vm7 = vcmp.eq.s32.totalorder %v2177_v17, %v126_v10  ;;  %vm536_vm12 = vcmp.eq.s32.totalorder %v2162_v11, %v417_v30 }
 0x132   :  { %1469 = vst [vmem:[#allocation2 + $0x28] sm:$0xff] %v1384_v6  ;;  %1728 = vmatmul.msk.f32.gmra.mxu2 %vm654_vm1, %v1805_v20  ;;  %vm659_vm15 = vmor %vm243_vm10, %vm531_vm14  ;;  %vm532_vm1 = vcmp.eq.s32.totalorder %v2162_v11, %v414_v21  ;;  %vm248_vm14 = vcmp.eq.s32.totalorder %v2162_v11, %v129_v29 }
 0x133   :  { %1760 = vmatmul.msk.f32.gmra.mxu3 %vm655_vm3, %v1805_v20  ;;  %vm533_vm3 = vcmp.eq.s32.totalorder %v2168_v13, %v414_v21  ;;  %vm660_vm6 = vmor %vm244_vm0, %vm532_vm1  ;;  %vm249_vm1 = vcmp.eq.s32.totalorder %v2168_v13, %v129_v29 }
 0x134   :  { %vm661_vm9 = vmor %vm245_vm2, %vm533_vm3  ;;  %vm539_vm2 = vcmp.eq.s32.totalorder %v2177_v17, %v417_v30 }
 0x135   :  { %v1273_v9 = vpop.f32.mrf.mxu2  ;;  %v1050_v16 = vpop.f32.mrf.mxu0  ;;  %vm662_vm10 = vmor %vm246_vm4, %vm534_vm5  ;;  %vm250_vm4 = vcmp.eq.s32.totalorder %v2171_v14, %v129_v29 }
 0x136   :  { %v1274_v12 = vadd.f32 %v1273_v9, %v1161_v8  ;;  %v1386_v15 = vpop.f32.mrf.mxu3  ;;  %v1163_v18 = vpop.f32.mrf.mxu1  ;;  %vm664_vm0 = vmor %vm248_vm14, %vm536_vm12  ;;  %vm255_vm14 = vcmp.eq.s32.totalorder %v2177_v17, %v132_v33 }
 0x137   :  { %v1164_v22 = vadd.f32 %v1163_v18, %v1050_v16 }
 0x138   :  { %v1387_v19 = vadd.f32 %v1386_v15, %v1274_v12  ;;  %1665 = vmatmul.msk.f32.gmra.mxu0 %vm656_vm8, %v1805_v20  ;;  %vm535_vm8 = vcmp.eq.s32.totalorder %v2177_v17, %v414_v21  ;;  %v432_v12 = vpop.permute.xlu1 %431 }
 0x139   :  { %1697 = vmatmul.msk.f32.gmra.mxu1 %vm657_vm11, %v1805_v20  ;;  %vm663_vm11 = vmor %vm247_vm7, %vm535_vm8  ;;  %vm252_vm8 = vcmp.eq.s32.totalorder %v2162_v11, %v132_v33 }
 0x13a   :  { %1470 = vst [vmem:[#allocation2 + $0x30] sm:$0xff] %v1387_v19  ;;  %1729 = vmatmul.msk.f32.gmra.mxu2 %vm658_vm13, %v1805_v20  ;;  %vm537_vm13 = vcmp.eq.s32.totalorder %v2168_v13, %v417_v30 }
 0x13b   :  { %1761 = vmatmul.msk.f32.gmra.mxu3 %vm659_vm15, %v1805_v20  ;;  %vm538_vm15 = vcmp.eq.s32.totalorder %v2171_v14, %v417_v30  ;;  %vm665_vm3 = vmor %vm249_vm1, %vm537_vm13  ;;  %vm541_vm13 = vcmp.eq.s32.totalorder %v2168_v13, %v420_v39 }
 0x13c   :  { %vm666_vm5 = vmor %vm250_vm4, %vm538_vm15  ;;  %vm256_vm4 = vcmp.eq.s32.totalorder %v2162_v11, %v135_v42 }
 0x13d   :  { %v1276_v23 = vpop.f32.mrf.mxu2  ;;  %v1053_v26 = vpop.f32.mrf.mxu0 }
 0x13e   :  { %v1277_v24 = vadd.f32 %v1276_v23, %v1164_v22  ;;  %v1389_v25 = vpop.f32.mrf.mxu3  ;;  %v1166_v27 = vpop.f32.mrf.mxu1 }
 0x13f   :  { %v1167_v31 = vadd.f32 %v1166_v27, %v1053_v26 }
 0x140   :  { %v1390_v28 = vadd.f32 %v1389_v25, %v1277_v24  ;;  %1666 = vmatmul.msk.f32.gmra.mxu0 %vm660_vm6, %v1805_v20  ;;  %vm251_vm6 = vcmp.eq.s32.totalorder %v2177_v17, %v129_v29  ;;  %v435_v24 = vpop.permute.xlu0 %434  ;;  %v147_v25 = vpop.permute.xlu2 %146 }
 0x141   :  { %1698 = vmatmul.msk.f32.gmra.mxu1 %vm661_vm9, %v1805_v20  ;;  %vm667_vm7 = vmor %vm251_vm6, %vm539_vm2  ;;  %vm253_vm9 = vcmp.eq.s32.totalorder %v2168_v13, %v132_v33  ;;  %vm543_vm2 = vcmp.eq.s32.totalorder %v2177_v17, %v420_v39  ;;  %vm257_vm6 = vcmp.eq.s32.totalorder %v2168_v13, %v135_v42 }
 0x142   :  { %1471 = vst [vmem:[#allocation2 + $0x38] sm:$0xff] %v1390_v28  ;;  %1730 = vmatmul.msk.f32.gmra.mxu2 %vm662_vm10, %v1805_v20  ;;  %vm540_vm10 = vcmp.eq.s32.totalorder %v2162_v11, %v420_v39  ;;  %vm669_vm15 = vmor %vm253_vm9, %vm541_vm13  ;;  %vm546_vm9 = vcmp.eq.s32.totalorder %v2171_v14, %v423_v48 }
 0x143   :  { %1762 = vmatmul.msk.f32.gmra.mxu3 %vm663_vm11, %v1805_v20  ;;  %vm254_vm11 = vcmp.eq.s32.totalorder %v2171_v14, %v132_v33  ;;  %vm668_vm12 = vmor %vm252_vm8, %vm540_vm10  ;;  %vm258_vm8 = vcmp.eq.s32.totalorder %v2171_v14, %v135_v42 }
 0x145   :  { %v1279_v32 = vpop.f32.mrf.mxu2  ;;  %v1056_v36 = vpop.f32.mrf.mxu0 }
 0x146   :  { %v1280_v34 = vadd.f32 %v1279_v32, %v1167_v31  ;;  %v1392_v35 = vpop.f32.mrf.mxu3  ;;  %v1169_v37 = vpop.f32.mrf.mxu1 }
 0x147   :  { %v1170_v40 = vadd.f32 %v1169_v37, %v1056_v36 }
 0x148   :  { %v1393_v38 = vadd.f32 %v1392_v35, %v1280_v34  ;;  %1667 = vmatmul.msk.f32.gmra.mxu0 %vm664_vm0, %v1805_v20  ;;  %vm542_vm0 = vcmp.eq.s32.totalorder %v2171_v14, %v420_v39 }
 0x149   :  { %1699 = vmatmul.msk.f32.gmra.mxu1 %vm665_vm3, %v1805_v20  ;;  %vm670_vm1 = vmor %vm254_vm11, %vm542_vm0  ;;  %vm259_vm11 = vcmp.eq.s32.totalorder %v2177_v17, %v135_v42  ;;  %vm548_vm0 = vcmp.eq.s32.totalorder %v2162_v11, %v426_v57 }
 0x14a   :  { %1472 = vst [vmem:[#allocation2 + $0x40] sm:$0xff] %v1393_v38  ;;  %1731 = vmatmul.msk.f32.gmra.mxu2 %vm666_vm5, %v1805_v20  ;;  %vm671_vm3 = vmor %vm255_vm14, %vm543_vm2  ;;  %vm544_vm5 = vcmp.eq.s32.totalorder %v2162_v11, %v423_v48  ;;  %vm260_vm2 = vcmp.eq.s32.totalorder %v2162_v11, %v138_v56 }
 0x14b   :  { %1763 = vmatmul.msk.f32.gmra.mxu3 %vm667_vm7, %v1805_v20  ;;  %vm545_vm7 = vcmp.eq.s32.totalorder %v2168_v13, %v423_v48  ;;  %vm672_vm10 = vmor %vm256_vm4, %vm544_vm5  ;;  %vm261_vm5 = vcmp.eq.s32.totalorder %v2168_v13, %v138_v56 }
 0x14c   :  { %vm673_vm13 = vmor %vm257_vm6, %vm545_vm7  ;;  %vm551_vm6 = vcmp.eq.s32.totalorder %v2177_v17, %v426_v57 }
 0x14d   :  { %v1282_v41 = vpop.f32.mrf.mxu2  ;;  %v1059_v45 = vpop.f32.mrf.mxu0  ;;  %vm674_vm14 = vmor %vm258_vm8, %vm546_vm9  ;;  %vm262_vm8 = vcmp.eq.s32.totalorder %v2171_v14, %v138_v56 }
 0x14e   :  { %v1283_v43 = vadd.f32 %v1282_v41, %v1170_v40  ;;  %v1395_v44 = vpop.f32.mrf.mxu3  ;;  %v1172_v46 = vpop.f32.mrf.mxu1  ;;  %vm676_vm4 = vmor %vm260_vm2, %vm548_vm0  ;;  %vm267_vm2 = vcmp.eq.s32.totalorder %v2177_v17, %v141_v60 }
 0x14f   :  { %v1173_v49 = vadd.f32 %v1172_v46, %v1059_v45 }
 0x150   :  { %v1396_v47 = vadd.f32 %v1395_v44, %v1283_v43  ;;  %1668 = vmatmul.msk.f32.gmra.mxu0 %vm668_vm12, %v1805_v20  ;;  %vm547_vm12 = vcmp.eq.s32.totalorder %v2177_v17, %v423_v48 }
 0x151   :  { %1700 = vmatmul.msk.f32.gmra.mxu1 %vm669_vm15, %v1805_v20  ;;  %vm675_vm15 = vmor %vm259_vm11, %vm547_vm12  ;;  %vm264_vm12 = vcmp.eq.s32.totalorder %v2162_v11, %v141_v60 }
 0x152   :  { %1473 = vst [vmem:[#allocation2 + $0x48] sm:$0xff] %v1396_v47  ;;  %1732 = vmatmul.msk.f32.gmra.mxu2 %vm670_vm1, %v1805_v20  ;;  %vm549_vm1 = vcmp.eq.s32.totalorder %v2168_v13, %v426_v57 }
 0x153   :  { %1764 = vmatmul.msk.f32.gmra.mxu3 %vm671_vm3, %v1805_v20  ;;  %vm550_vm3 = vcmp.eq.s32.totalorder %v2171_v14, %v426_v57  ;;  %vm677_vm7 = vmor %vm261_vm5, %vm549_vm1  ;;  %vm553_vm1 = vcmp.eq.s32.totalorder %v2168_v13, %v429_v2 }
 0x154   :  { %vm678_vm9 = vmor %vm262_vm8, %vm550_vm3  ;;  %vm556_vm8 = vcmp.eq.s32.totalorder %v2162_v11, %v432_v12 }
 0x155   :  { %v1285_v50 = vpop.f32.mrf.mxu2  ;;  %v1062_v53 = vpop.f32.mrf.mxu0 }
 0x156   :  { %v1286_v51 = vadd.f32 %v1285_v50, %v1173_v49  ;;  %v1398_v52 = vpop.f32.mrf.mxu3  ;;  %v1175_v54 = vpop.f32.mrf.mxu1 }
 0x157   :  { %v1176_v58 = vadd.f32 %v1175_v54, %v1062_v53 }
 0x158   :  { %v1399_v55 = vadd.f32 %v1398_v52, %v1286_v51  ;;  %1669 = vmatmul.msk.f32.gmra.mxu0 %vm672_vm10, %v1805_v20  ;;  %vm263_vm10 = vcmp.eq.s32.totalorder %v2177_v17, %v138_v56 }
 0x159   :  { %1701 = vmatmul.msk.f32.gmra.mxu1 %vm673_vm13, %v1805_v20  ;;  %vm679_vm11 = vmor %vm263_vm10, %vm551_vm6  ;;  %vm265_vm13 = vcmp.eq.s32.totalorder %v2168_v13, %v141_v60  ;;  %vm555_vm6 = vcmp.eq.s32.totalorder %v2177_v17, %v429_v2  ;;  %vm557_vm10 = vcmp.eq.s32.totalorder %v2168_v13, %v432_v12 }
 0x15a   :  { %1474 = vst [vmem:[#allocation2 + $0x50] sm:$0xff] %v1399_v55  ;;  %1733 = vmatmul.msk.f32.gmra.mxu2 %vm674_vm14, %v1805_v20  ;;  %vm552_vm14 = vcmp.eq.s32.totalorder %v2162_v11, %v429_v2  ;;  %vm681_vm3 = vmor %vm265_vm13, %vm553_vm1  ;;  %vm270_vm13 = vcmp.eq.s32.totalorder %v2171_v14, %v144_v5 }
 0x15b   :  { %1765 = vmatmul.msk.f32.gmra.mxu3 %vm675_vm15, %v1805_v20  ;;  %vm266_vm15 = vcmp.eq.s32.totalorder %v2171_v14, %v141_v60  ;;  %vm680_vm0 = vmor %vm264_vm12, %vm552_vm14  ;;  %vm558_vm12 = vcmp.eq.s32.totalorder %v2171_v14, %v432_v12  ;;  %vm559_vm14 = vcmp.eq.s32.totalorder %v2177_v17, %v432_v12 }
 0x15d   :  { %v1288_v59 = vpop.f32.mrf.mxu2  ;;  %v1065_v63 = vpop.f32.mrf.mxu0 }
 0x15e   :  { %v1289_v61 = vadd.f32 %v1288_v59, %v1176_v58  ;;  %v1401_v62 = vpop.f32.mrf.mxu3  ;;  %v1178_v0 = vpop.f32.mrf.mxu1 }
 0x15f   :  { %v1179_v3 = vadd.f32 %v1178_v0, %v1065_v63 }
 0x160   :  { %v1402_v1 = vadd.f32 %v1401_v62, %v1289_v61  ;;  %1670 = vmatmul.msk.f32.gmra.mxu0 %vm676_vm4, %v1805_v20  ;;  %vm554_vm4 = vcmp.eq.s32.totalorder %v2171_v14, %v429_v2 }
 0x161   :  { %1702 = vmatmul.msk.f32.gmra.mxu1 %vm677_vm7, %v1805_v20  ;;  %vm682_vm5 = vmor %vm266_vm15, %vm554_vm4  ;;  %vm560_vm4 = vcmp.eq.s32.totalorder %v2162_v11, %v435_v24 }
 0x162   :  { %1475 = vst [vmem:[#allocation2 + $0x58] sm:$0xff] %v1402_v1  ;;  %1734 = vmatmul.msk.f32.gmra.mxu2 %vm678_vm9, %v1805_v20  ;;  %vm683_vm7 = vmor %vm267_vm2, %vm555_vm6  ;;  %vm268_vm9 = vcmp.eq.s32.totalorder %v2162_v11, %v144_v5  ;;  %vm272_vm6 = vcmp.eq.s32.totalorder %v2162_v11, %v147_v25 }
 0x163   :  { %1766 = vmatmul.msk.f32.gmra.mxu3 %vm679_vm11, %v1805_v20  ;;  %vm269_vm11 = vcmp.eq.s32.totalorder %v2168_v13, %v144_v5  ;;  %vm684_vm15 = vmor %vm268_vm9, %vm556_vm8  ;;  %vm273_vm8 = vcmp.eq.s32.totalorder %v2168_v13, %v147_v25  ;;  %vm563_vm9 = vcmp.eq.s32.totalorder %v2177_v17, %v435_v24 }
 0x164   :  { %vm685_vm1 = vmor %vm269_vm11, %vm557_vm10  ;;  %vm274_vm11 = vcmp.eq.s32.totalorder %v2171_v14, %v147_v25 }
 0x165   :  { %v1291_v4 = vpop.f32.mrf.mxu2  ;;  %v1068_v8 = vpop.f32.mrf.mxu0  ;;  %vm686_vm2 = vmor %vm270_vm13, %vm558_vm12  ;;  %vm275_vm13 = vcmp.eq.s32.totalorder %v2177_v17, %v147_v25 }
 0x166   :  { %v1292_v6 = vadd.f32 %v1291_v4, %v1179_v3  ;;  %v1404_v7 = vpop.f32.mrf.mxu3  ;;  %v1181_v9 = vpop.f32.mrf.mxu1  ;;  %vm688_vm10 = vmor %vm272_vm6, %vm560_vm4 }
 0x167   :  { %v1182_v15 = vadd.f32 %v1181_v9, %v1068_v8 }
 0x168   :  { %v1405_v10 = vadd.f32 %v1404_v7, %v1292_v6  ;;  %1671 = vmatmul.msk.f32.gmra.mxu0 %vm680_vm0, %v1805_v20  ;;  %vm271_vm0 = vcmp.eq.s32.totalorder %v2177_v17, %v144_v5 }
 0x169   :  { %1703 = vmatmul.msk.f32.gmra.mxu1 %vm681_vm3, %v1805_v20  ;;  %vm687_vm3 = vmor %vm271_vm0, %vm559_vm14 }
 0x16a   :  { %1476 = vst [vmem:[#allocation2 + $0x60] sm:$0xff] %v1405_v10  ;;  %1735 = vmatmul.msk.f32.gmra.mxu2 %vm682_vm5, %v1805_v20  ;;  %vm561_vm5 = vcmp.eq.s32.totalorder %v2168_v13, %v435_v24 }
 0x16b   :  { %1767 = vmatmul.msk.f32.gmra.mxu3 %vm683_vm7, %v1805_v20  ;;  %vm562_vm7 = vcmp.eq.s32.totalorder %v2171_v14, %v435_v24  ;;  %vm689_vm12 = vmor %vm273_vm8, %vm561_vm5 }
 0x16c   :  { %vm690_vm14 = vmor %vm274_vm11, %vm562_vm7 }
 0x16d   :  { %v1294_v16 = vpop.f32.mrf.mxu2  ;;  %v1071_v21 = vpop.f32.mrf.mxu0 }
 0x16e   :  { %v1295_v18 = vadd.f32 %v1294_v16, %v1182_v15  ;;  %v1407_v19 = vpop.f32.mrf.mxu3  ;;  %v1184_v22 = vpop.f32.mrf.mxu1 }
 0x16f   :  { %v1185_v26 = vadd.f32 %v1184_v22, %v1071_v21 }
 0x170   :  { %v1408_v23 = vadd.f32 %v1407_v19, %v1295_v18  ;;  %1672 = vmatmul.msk.f32.gmra.mxu0 %vm684_vm15, %v1805_v20  ;;  %vm691_vm15 = vmor %vm275_vm13, %vm563_vm9 }
 0x171   :  { %1704 = vmatmul.msk.f32.gmra.mxu1 %vm685_vm1, %v1805_v20 }
 0x172   :  { %1477 = vst [vmem:[#allocation2 + $0x68] sm:$0xff] %v1408_v23  ;;  %1736 = vmatmul.msk.f32.gmra.mxu2 %vm686_vm2, %v1805_v20 }
 0x173   :  { %1768 = vmatmul.msk.f32.gmra.mxu3 %vm687_vm3, %v1805_v20 }
 0x175   :  { %v1297_v27 = vpop.f32.mrf.mxu2  ;;  %v1074_v30 = vpop.f32.mrf.mxu0 }
 0x176   :  { %v1298_v28 = vadd.f32 %v1297_v27, %v1185_v26  ;;  %v1410_v29 = vpop.f32.mrf.mxu3  ;;  %v1187_v31 = vpop.f32.mrf.mxu1 }
 0x177   :  { %v1188_v11 = vadd.f32 %v1187_v31, %v1074_v30 }
 0x178   :  { %v1411_v32 = vadd.f32 %v1410_v29, %v1298_v28  ;;  %1673 = vmatmul.msk.f32.gmra.mxu0 %vm688_vm10, %v1805_v20 }
 0x179   :  { %1705 = vmatmul.msk.f32.gmra.mxu1 %vm689_vm12, %v1805_v20 }
 0x17a   :  { %1478 = vst [vmem:[#allocation2 + $0x70] sm:$0xff] %v1411_v32  ;;  %1737 = vmatmul.msk.f32.gmra.mxu2 %vm690_vm14, %v1805_v20 }
 0x17b   :  { %1769 = vmatmul.msk.f32.gmra.mxu3 %vm691_vm15, %v1805_v20 }
 0x17d   :  { %v1300_v13 = vpop.f32.mrf.mxu2  ;;  %v1077_v14 = vpop.f32.mrf.mxu0 }
 0x17e   :  { %v1301_v33 = vadd.f32 %v1300_v13, %v1188_v11  ;;  %v1413_v34 = vpop.f32.mrf.mxu3  ;;  %v1190_v35 = vpop.f32.mrf.mxu1 }
 0x17f   :  { %v1191_v37 = vadd.f32 %v1190_v35, %v1077_v14 }
 0x180   :  { %v1414_v36 = vadd.f32 %v1413_v34, %v1301_v33 }
 0x182   :  { %1479 = vst [vmem:[#allocation2 + $0x78] sm:$0xff] %v1414_v36 }
 0x185   :  { %v1303_v38 = vpop.f32.mrf.mxu2  ;;  %v1080_v40 = vpop.f32.mrf.mxu0 }
 0x186   :  { %v1304_v17 = vadd.f32 %v1303_v38, %v1191_v37  ;;  %v1416_v39 = vpop.f32.mrf.mxu3  ;;  %v1193_v41 = vpop.f32.mrf.mxu1 }
 0x187   :  { %v1194_v43 = vadd.f32 %v1193_v41, %v1080_v40 }
 0x188   :  { %v1417_v42 = vadd.f32 %v1416_v39, %v1304_v17 }
 0x18a   :  { %1480 = vst [vmem:[#allocation2 + $0x80] sm:$0xff] %v1417_v42 }
 0x18d   :  { %v1306_v44 = vpop.f32.mrf.mxu2  ;;  %v1083_v46 = vpop.f32.mrf.mxu0 }
 0x18e   :  { %v1307_v45 = vadd.f32 %v1306_v44, %v1194_v43  ;;  %v1419_v20 = vpop.f32.mrf.mxu3  ;;  %v1196_v47 = vpop.f32.mrf.mxu1 }
 0x18f   :  { %v1197_v49 = vadd.f32 %v1196_v47, %v1083_v46 }
 0x190   :  { %v1420_v48 = vadd.f32 %v1419_v20, %v1307_v45 }
 0x192   :  { %1481 = vst [vmem:[#allocation2 + $0x88] sm:$0xff] %v1420_v48 }
 0x195   :  { %v1309_v50 = vpop.f32.mrf.mxu2  ;;  %v1086_v53 = vpop.f32.mrf.mxu0 }
 0x196   :  { %v1310_v51 = vadd.f32 %v1309_v50, %v1197_v49  ;;  %v1422_v52 = vpop.f32.mrf.mxu3  ;;  %v1199_v54 = vpop.f32.mrf.mxu1 }
 0x197   :  { %v1200_v56 = vadd.f32 %v1199_v54, %v1086_v53 }
 0x198   :  { %v1423_v55 = vadd.f32 %v1422_v52, %v1310_v51 }
 0x19a   :  { %1482 = vst [vmem:[#allocation2 + $0x90] sm:$0xff] %v1423_v55 }
 0x19d   :  { %v1312_v57 = vpop.f32.mrf.mxu2  ;;  %v1089_v60 = vpop.f32.mrf.mxu0 }
 0x19e   :  { %v1313_v58 = vadd.f32 %v1312_v57, %v1200_v56  ;;  %v1425_v59 = vpop.f32.mrf.mxu3  ;;  %v1202_v61 = vpop.f32.mrf.mxu1 }
 0x19f   :  { %v1203_v63 = vadd.f32 %v1202_v61, %v1089_v60 }
 0x1a0   :  { %v1426_v62 = vadd.f32 %v1425_v59, %v1313_v58 }
 0x1a2   :  { %1483 = vst [vmem:[#allocation2 + $0x98] sm:$0xff] %v1426_v62 }
 0x1a5   :  { %v1315_v0 = vpop.f32.mrf.mxu2  ;;  %v1092_v3 = vpop.f32.mrf.mxu0 }
 0x1a6   :  { %v1316_v1 = vadd.f32 %v1315_v0, %v1203_v63  ;;  %v1428_v2 = vpop.f32.mrf.mxu3  ;;  %v1205_v4 = vpop.f32.mrf.mxu1 }
 0x1a7   :  { %v1206_v6 = vadd.f32 %v1205_v4, %v1092_v3 }
 0x1a8   :  { %v1429_v5 = vadd.f32 %v1428_v2, %v1316_v1 }
 0x1aa   :  { %1484 = vst [vmem:[#allocation2 + $0xa0] sm:$0xff] %v1429_v5 }
 0x1ad   :  { %v1318_v7 = vpop.f32.mrf.mxu2  ;;  %v1095_v10 = vpop.f32.mrf.mxu0 }
 0x1ae   :  { %v1319_v8 = vadd.f32 %v1318_v7, %v1206_v6  ;;  %v1431_v9 = vpop.f32.mrf.mxu3  ;;  %v1208_v12 = vpop.f32.mrf.mxu1 }
 0x1af   :  { %v1209_v16 = vadd.f32 %v1208_v12, %v1095_v10 }
 0x1b0   :  { %v1432_v15 = vadd.f32 %v1431_v9, %v1319_v8 }
 0x1b2   :  { %1485 = vst [vmem:[#allocation2 + $0xa8] sm:$0xff] %v1432_v15 }
 0x1b5   :  { %v1321_v18 = vpop.f32.mrf.mxu2  ;;  %v1098_v22 = vpop.f32.mrf.mxu0 }
 0x1b6   :  { %v1322_v19 = vadd.f32 %v1321_v18, %v1209_v16  ;;  %v1434_v21 = vpop.f32.mrf.mxu3  ;;  %v1211_v23 = vpop.f32.mrf.mxu1 }
 0x1b7   :  { %v1212_v25 = vadd.f32 %v1211_v23, %v1098_v22 }
 0x1b8   :  { %v1435_v24 = vadd.f32 %v1434_v21, %v1322_v19 }
 0x1ba   :  { %1486 = vst [vmem:[#allocation2 + $0xb0] sm:$0xff] %v1435_v24 }
 0x1bd   :  { %v1324_v26 = vpop.f32.mrf.mxu2  ;;  %v1101_v29 = vpop.f32.mrf.mxu0 }
 0x1be   :  { %v1325_v27 = vadd.f32 %v1324_v26, %v1212_v25  ;;  %v1437_v28 = vpop.f32.mrf.mxu3  ;;  %v1214_v30 = vpop.f32.mrf.mxu1 }
 0x1bf   :  { %v1215_v32 = vadd.f32 %v1214_v30, %v1101_v29 }
 0x1c0   :  { %v1438_v31 = vadd.f32 %v1437_v28, %v1325_v27 }
 0x1c2   :  { %1487 = vst [vmem:[#allocation2 + $0xb8] sm:$0xff] %v1438_v31 }
 0x1c5   :  { %v1327_v11 = vpop.f32.mrf.mxu2  ;;  %v1104_v34 = vpop.f32.mrf.mxu0 }
 0x1c6   :  { %v1328_v13 = vadd.f32 %v1327_v11, %v1215_v32  ;;  %v1440_v33 = vpop.f32.mrf.mxu3  ;;  %v1217_v14 = vpop.f32.mrf.mxu1 }
 0x1c7   :  { %v1218_v36 = vadd.f32 %v1217_v14, %v1104_v34 }
 0x1c8   :  { %v1441_v35 = vadd.f32 %v1440_v33, %v1328_v13 }
 0x1ca   :  { %1488 = vst [vmem:[#allocation2 + $0xc0] sm:$0xff] %v1441_v35 }
 0x1cd   :  { %v1330_v37 = vpop.f32.mrf.mxu2  ;;  %v1107_v39 = vpop.f32.mrf.mxu0 }
 0x1ce   :  { %v1331_v38 = vadd.f32 %v1330_v37, %v1218_v36  ;;  %v1443_v17 = vpop.f32.mrf.mxu3  ;;  %v1220_v40 = vpop.f32.mrf.mxu1 }
 0x1cf   :  { %v1221_v42 = vadd.f32 %v1220_v40, %v1107_v39 }
 0x1d0   :  { %v1444_v41 = vadd.f32 %v1443_v17, %v1331_v38 }
 0x1d2   :  { %1489 = vst [vmem:[#allocation2 + $0xc8] sm:$0xff] %v1444_v41 }
 0x1d5   :  { %v1333_v43 = vpop.f32.mrf.mxu2  ;;  %v1110_v20 = vpop.f32.mrf.mxu0 }
 0x1d6   :  { %v1334_v44 = vadd.f32 %v1333_v43, %v1221_v42  ;;  %v1446_v45 = vpop.f32.mrf.mxu3  ;;  %v1223_v46 = vpop.f32.mrf.mxu1 }
 0x1d7   :  { %v1224_v48 = vadd.f32 %v1223_v46, %v1110_v20 }
 0x1d8   :  { %v1447_v47 = vadd.f32 %v1446_v45, %v1334_v44 }
 0x1da   :  { %1490 = vst [vmem:[#allocation2 + $0xd0] sm:$0xff] %v1447_v47 }
 0x1dd   :  { %v1336_v49 = vpop.f32.mrf.mxu2  ;;  %v1113_v52 = vpop.f32.mrf.mxu0 }
 0x1de   :  { %v1337_v50 = vadd.f32 %v1336_v49, %v1224_v48  ;;  %v1449_v51 = vpop.f32.mrf.mxu3  ;;  %v1226_v53 = vpop.f32.mrf.mxu1 }
 0x1df   :  { %v1227_v55 = vadd.f32 %v1226_v53, %v1113_v52 }
 0x1e0   :  { %v1450_v54 = vadd.f32 %v1449_v51, %v1337_v50 }
 0x1e2   :  { %1491 = vst [vmem:[#allocation2 + $0xd8] sm:$0xff] %v1450_v54 }
 0x1e5   :  { %v1339_v56 = vpop.f32.mrf.mxu2  ;;  %v1116_v59 = vpop.f32.mrf.mxu0 }
 0x1e6   :  { %v1340_v57 = vadd.f32 %v1339_v56, %v1227_v55  ;;  %v1452_v58 = vpop.f32.mrf.mxu3  ;;  %v1229_v60 = vpop.f32.mrf.mxu1 }
 0x1e7   :  { %v1230_v62 = vadd.f32 %v1229_v60, %v1116_v59 }
 0x1e8   :  { %v1453_v61 = vadd.f32 %v1452_v58, %v1340_v57 }
 0x1ea   :  { %1492 = vst [vmem:[#allocation2 + $0xe0] sm:$0xff] %v1453_v61 }
 0x1ed   :  { %v1342_v63 = vpop.f32.mrf.mxu2  ;;  %v1119_v2 = vpop.f32.mrf.mxu0 }
 0x1ee   :  { %v1343_v0 = vadd.f32 %v1342_v63, %v1230_v62  ;;  %v1455_v1 = vpop.f32.mrf.mxu3  ;;  %v1232_v3 = vpop.f32.mrf.mxu1 }
 0x1ef   :  { %v1233_v5 = vadd.f32 %v1232_v3, %v1119_v2 }
 0x1f0   :  { %v1456_v4 = vadd.f32 %v1455_v1, %v1343_v0 }
 0x1f2   :  { %1493 = vst [vmem:[#allocation2 + $0xe8] sm:$0xff] %v1456_v4 }
 0x1f5   :  { %v1345_v6 = vpop.f32.mrf.mxu2  ;;  %v1122_v10 = vpop.f32.mrf.mxu0 }
 0x1f6   :  { %v1346_v7 = vadd.f32 %v1345_v6, %v1233_v5  ;;  %v1458_v8 = vpop.f32.mrf.mxu3  ;;  %v1235_v12 = vpop.f32.mrf.mxu1 }
 0x1f7   :  { %v1236_v15 = vadd.f32 %v1235_v12, %v1122_v10 }
 0x1f8   :  { %v1459_v9 = vadd.f32 %v1458_v8, %v1346_v7 }
 0x1fa   :  { %1494 = vst [vmem:[#allocation2 + $0xf0] sm:$0xff] %v1459_v9 }
 0x1fd   :  { %v1348_v16 = vpop.f32.mrf.mxu2 }
 0x1fe   :  { %v1349_v18 = vadd.f32 %v1348_v16, %v1236_v15  ;;  %v1461_v19 = vpop.f32.mrf.mxu3 }
 0x200   :  { %v1462_v21 = vadd.f32 %v1461_v19, %v1349_v18 }
 0x202   :  { %1495 = vst [vmem:[#allocation2 + $0xf8] sm:$0xff] %v1462_v21 }
 0x203   :  { %1508 = dma.vmem_to_hbm [thread:$0]  %s1501_s1, 4096, %s1503_s25, [#allocation3], %s1807_s26, %s1807_s26, %s1808_s27  }
 0x204   :  { %1802 = dma.done.wait [#allocation3], 4096  }
 0x205   :  { %1803 = vsyncadd [#allocation3], 4294963200 }
 0x206   :  { %1513 = vsyncpa [#allocation3], 1 }

</bundles_post_ra>
